<compile_context>
chip_gen: v5e
topology: v5e:2x2
jax: 0.10.0
libtpu: 0.0.40
codegen_flags: <defaults>
</compile_context>

<pallas_src>
import jax
import jax.numpy as jnp
from jax import lax
from jax.experimental import pallas as pl
from jax.experimental.pallas import tpu as pltpu

# --- small, TPU-friendly shapes consistent with the module ----------------
DIN = 128        # id_embeddings_dim
DHID = 2 * DIN   # hidden dim of first Linear
C = 128          # cross_attention_dim
T = 4            # num_tokens
DOUT = C * T     # output dim of second Linear
EPS = 1e-5       # LayerNorm eps (PyTorch default)


def _gelu_exact(x):
    # torch.nn.GELU() default (approximate='none'): 0.5*x*(1+erf(x/sqrt(2)))
    return 0.5 * x * (1.0 + lax.erf(x * 0.7071067811865475))


def mlp_proj_kernel(x_ref, w1_ref, b1_ref, w2_ref, b2_ref, g_ref, be_ref,
                    o_ref, h_ref):
    # Grid = (batch_tile i, dout_tile j), j innermost ("arbitrary").
    # Hidden activation h is computed once per batch tile and cached (bf16).
    @pl.when(pl.program_id(1) == 0)
    def _():
        h = jnp.dot(x_ref[...].astype(jnp.bfloat16), w1_ref[...],
                    preferred_element_type=jnp.float32) + b1_ref[...]
        h_ref[...] = _gelu_exact(h).astype(jnp.bfloat16)

    h_b = h_ref[...]            # (tb, DHID) bf16
    gamma = g_ref[...]          # (1, C) f32
    betav = be_ref[...]         # (1, C) f32
    c = g_ref.shape[-1]
    tn = o_ref.shape[-1]        # multiple of C

    # Fused Linear2 + LayerNorm, one lane-aligned (tb, C) token slab at a
    # time: live f32 set stays small (no spill), stores are full-width vst.
    for t in range(tn // c):
        sl = slice(t * c, (t + 1) * c)
        yt = jnp.dot(h_b, w2_ref[:, sl],
                     preferred_element_type=jnp.float32) + b2_ref[:, sl]
        # One-pass LN statistics (biased variance, like torch) + folded affine.
        mean = jnp.mean(yt, axis=-1, keepdims=True)
        var = jnp.mean(yt * yt, axis=-1, keepdims=True) - mean * mean
        scale = lax.rsqrt(var + EPS) * gamma          # (tb, C)
        o_ref[:, sl] = yt * scale + (betav - mean * scale)


def _is_multi_tensorcore():
    # v7x has 2 TensorCores per chip; v5e/v6e have 1.
    try:
        kind = jax.devices()[0].device_kind.lower()
    except Exception:
        return False
    return ("v7" in kind) or ("7x" in kind)


def _round8(n):
    return ((n + 7) // 8) * 8


def _pick_tb(bt, multi_core):
    # Single-TC chips: grid is a serial loop, so take the biggest tile (fills
    # MXU rows, avoids ~0.35us/step overhead).  v7x: force >= 2 batch steps so
    # the "parallel" axis can shard across both TensorCores.
    if multi_core:
        return min(256, max(8, _round8(-(-bt // 2))))
    return min(256, _round8(bt))


def _pick_tn(dout, c):
    # Largest multiple of C that divides DOUT and keeps the bf16 W2 tile
    # modest (<= ~2048 lanes) so production sizes fit v7x's 64 MiB VMEM.
    t = dout // c
    best = 1
    for d in range(1, t + 1):
        if t % d == 0 and c * d <= max(2048, c):
            best = d
    return c * best


def prepare_params(w1, b1, w2, b2, gamma, beta):
    """One-time parameter prep (do NOT call per forward): cast matmul weights
    to bf16 and reshape biases / LN params to 2-D rows."""
    c = gamma.shape[0]
    return dict(
        w1=w1.astype(jnp.bfloat16),
        b1=b1.reshape(1, -1).astype(jnp.float32),
        w2=w2.astype(jnp.bfloat16),
        b2=b2.reshape(1, -1).astype(jnp.float32),
        gamma=gamma.reshape(1, c).astype(jnp.float32),
        beta=beta.reshape(1, c).astype(jnp.float32),
    )


def mlp_proj_model(id_embeds, params, *, num_tokens=T):
    """id_embeds: (B, Din).  params: output of prepare_params.
    Returns (B, num_tokens, C) f32."""
    bt, din = id_embeds.shape
    dhid = params["w1"].shape[1]
    dout = params["w2"].shape[1]
    c = params["gamma"].shape[1]
    assert params["w1"].shape[0] == din and dout == c * num_tokens

    multi_core = _is_multi_tensorcore()
    tb = _pick_tb(bt, multi_core)
    tn = _pick_tn(dout, c)
    nb = pl.cdiv(bt, tb)
    nd = dout // tn
    rows = nb * tb

    cost = pl.CostEstimate(
        flops=2 * rows * (din * dhid + dhid * dout),
        transcendentals=rows * dhid,                     # erf in GELU
        bytes_accessed=(rows * din * 4 + din * dhid * 2 + dhid * 4
                        + nb * dhid * dout * 2 + dout * 4 + 2 * c * 4
                        + rows * dout * 4),
    )

    # Rough per-step VMEM working set (double-buffered tiles + resident W1 +
    # bf16 h scratch).  Only raise the scoped limit if we actually need to.
    vmem_need = (2 * tb * din * 4 + din * dhid * 2 + dhid * 4
                 + 2 * dhid * tn * 2 + 2 * tn * 4
                 + 2 * tb * tn * 4 + tb * dhid * 2 + 2 * c * 4)
    cp_kwargs = {}
    if vmem_need > (32 << 20):
        cp_kwargs["vmem_limit_bytes"] = int(vmem_need * 1.25) + (2 << 20)

    out_flat = pl.pallas_call(
        mlp_proj_kernel,
        out_shape=jax.ShapeDtypeStruct((bt, dout), jnp.float32),
        grid_spec=pltpu.PrefetchScalarGridSpec(
            num_scalar_prefetch=0,
            grid=(nb, nd),
            in_specs=[
                pl.BlockSpec((tb, din), lambda i, j: (i, 0)),     # x tile
                pl.BlockSpec((din, dhid), lambda i, j: (0, 0)),   # W1 (bf16, resident)
                pl.BlockSpec((1, dhid), lambda i, j: (0, 0)),     # b1
                pl.BlockSpec((dhid, tn), lambda i, j: (0, j)),    # W2 tile (bf16)
                pl.BlockSpec((1, tn), lambda i, j: (0, j)),       # b2 tile
                pl.BlockSpec((1, c), lambda i, j: (0, 0)),        # LN gamma
                pl.BlockSpec((1, c), lambda i, j: (0, 0)),        # LN beta
            ],
            # Flat, lane-dense output (tb, tn): unmasked full-width stores.
            out_specs=pl.BlockSpec((tb, tn), lambda i, j: (i, j)),
            scratch_shapes=[pltpu.VMEM((tb, dhid), jnp.bfloat16)],  # cached h
        ),
        compiler_params=pltpu.CompilerParams(
            dimension_semantics=("parallel", "arbitrary"), **cp_kwargs),
        cost_estimate=cost,
    )(id_embeds, params["w1"], params["b1"], params["w2"], params["b2"],
      params["gamma"], params["beta"])

    # The (-1, T, C) reshape lives in the wrapper (layout plumbing, not compute).
    return out_flat.reshape(bt, num_tokens, c)


def reference(id_embeds, w1, b1, w2, b2, gamma, beta, cast_bf16):
    """Pure-JAX reference.  cast_bf16=True mirrors the kernel's MXU dtypes."""
    if cast_bf16:
        a, w1c = id_embeds.astype(jnp.bfloat16), w1.astype(jnp.bfloat16)
    else:
        a, w1c = id_embeds, w1
    h = jnp.dot(a, w1c, preferred_element_type=jnp.float32) + b1
    h = _gelu_exact(h)
    if cast_bf16:
        hc, w2c = h.astype(jnp.bfloat16), w2.astype(jnp.bfloat16)
    else:
        hc, w2c = h, w2
    y = jnp.dot(hc, w2c, preferred_element_type=jnp.float32) + b2
    y = y.reshape(-1, T, C)
    mean = y.mean(-1, keepdims=True)
    var = ((y - mean) ** 2).mean(-1, keepdims=True)
    return (y - mean) * lax.rsqrt(var + EPS) * gamma + beta


if __name__ == "__main__":
    key = jax.random.PRNGKey(0)
    k_x, k_w1, k_b1, k_w2, k_b2, k_g, k_be = jax.random.split(key, 7)

    w1 = jax.random.normal(k_w1, (DIN, DHID), dtype=jnp.float32) * 0.02
    b1 = jax.random.normal(k_b1, (DHID,), dtype=jnp.float32) * 0.02
    w2 = jax.random.normal(k_w2, (DHID, DOUT), dtype=jnp.float32) * 0.02
    b2 = jax.random.normal(k_b2, (DOUT,), dtype=jnp.float32) * 0.02
    gamma = 1.0 + 0.1 * jax.random.normal(k_g, (C,), dtype=jnp.float32)
    beta = 0.05 * jax.random.normal(k_be, (C,), dtype=jnp.float32)

    params = prepare_params(w1, b1, w2, b2, gamma, beta)   # one-time bf16 cast

    ok = True
    # B=16: even batch; B=13: exercises the ragged (masked) final block.
    for B in (16, 13):
        xk = jax.random.fold_in(k_x, B)
        id_embeds = jax.random.normal(xk, (B, DIN), dtype=jnp.float32)

        out = jax.block_until_ready(mlp_proj_model(id_embeds, params))
        assert out.shape == (B, T, C)

        # Check against a reference using the same bf16 MXU operand dtypes.
        ref_bf16 = reference(id_embeds, w1, b1, w2, b2, gamma, beta, cast_bf16=True)
        ok &= bool(jnp.allclose(out, ref_bf16, atol=5e-3, rtol=5e-3))

        # Loose check against the full-f32 (PyTorch-semantics) reference; the
        # only deviation is bf16 rounding of the MXU operands.
        ref_f32 = reference(id_embeds, w1, b1, w2, b2, gamma, beta, cast_bf16=False)
        ok &= bool(jnp.allclose(out, ref_f32, atol=1e-1, rtol=1e-1))

    assert ok
    print("KERNEL_OK")
</pallas_src>

<mosaic_0001>
module attributes {stable_mosaic.version = 11 : i64} {
  func.func @mlp_proj_kernel(%arg0: i32, %arg1: i32, %arg2: memref<16x128xf32, #tpu.memory_space<vmem>>, %arg3: memref<128x256xbf16, #tpu.memory_space<vmem>>, %arg4: memref<1x256xf32, #tpu.memory_space<vmem>>, %arg5: memref<256x512xbf16, #tpu.memory_space<vmem>>, %arg6: memref<1x512xf32, #tpu.memory_space<vmem>>, %arg7: memref<1x128xf32, #tpu.memory_space<vmem>>, %arg8: memref<1x128xf32, #tpu.memory_space<vmem>>, %arg9: memref<16x512xf32, #tpu.memory_space<vmem>>, %arg10: memref<16x256xbf16, #tpu.memory_space<vmem>>) attributes {dimension_semantics = [#tpu.dimension_semantics<parallel>, #tpu.dimension_semantics<arbitrary>], iteration_bounds = array<i64: 1, 1>, scalar_prefetch = 0 : i64, scratch_operands = 1 : i64, tpu.core_type = #tpu.core_type<tc>, window_params = [{transform_indices = @transform_0, window_bounds = array<i64: 16, 128>}, {pipeline_mode = #tpu.pipeline_mode<synchronous>, transform_indices = @transform_1, window_bounds = array<i64: 128, 256>}, {pipeline_mode = #tpu.pipeline_mode<synchronous>, transform_indices = @transform_2, window_bounds = array<i64: 1, 256>}, {transform_indices = @transform_3, window_bounds = array<i64: 256, 512>}, {transform_indices = @transform_4, window_bounds = array<i64: 1, 512>}, {pipeline_mode = #tpu.pipeline_mode<synchronous>, transform_indices = @transform_5, window_bounds = array<i64: 1, 128>}, {pipeline_mode = #tpu.pipeline_mode<synchronous>, transform_indices = @transform_6, window_bounds = array<i64: 1, 128>}, {transform_indices = @transform_7, window_bounds = array<i64: 16, 512>}]} {
    %c0_i32 = arith.constant 0 : i32
    %0 = arith.cmpi eq, %arg1, %c0_i32 : i32
    %1 = arith.extui %0 : i1 to i32
    %c0_i32_0 = arith.constant 0 : i32
    %2 = arith.cmpi ne, %1, %c0_i32_0 : i32
    scf.if %2 {
      %c0_50 = arith.constant 0 : index
      %c0_51 = arith.constant 0 : index
      %122 = vector.load %arg2[%c0_50, %c0_51] : memref<16x128xf32, #tpu.memory_space<vmem>>, vector<16x128xf32>
      %123 = arith.truncf %122 : vector<16x128xf32> to vector<16x128xbf16>
      %c0_52 = arith.constant 0 : index
      %c0_53 = arith.constant 0 : index
      %124 = vector.load %arg3[%c0_52, %c0_53] : memref<128x256xbf16, #tpu.memory_space<vmem>>, vector<128x256xbf16>
      %cst_54 = arith.constant dense<0.000000e+00> : vector<16x256xf32>
      %125 = tpu.matmul %123, %124, %cst_54 {dimension_numbers = #tpu.dot_dimension_numbers<[1], [0], [0], [1], [0, 0, 1, 1], [], []>} : vector<16x128xbf16>, vector<128x256xbf16>, vector<16x256xf32> -> vector<16x256xf32>
      %c0_55 = arith.constant 0 : index
      %c0_56 = arith.constant 0 : index
      %126 = vector.load %arg4[%c0_55, %c0_56] : memref<1x256xf32, #tpu.memory_space<vmem>>, vector<1x256xf32>
      %127 = vector.broadcast %126 : vector<1x256xf32> to vector<16x256xf32>
      %128 = arith.addf %125, %127 : vector<16x256xf32>
      %cst_57 = arith.constant 5.000000e-01 : f32
      %129 = vector.broadcast %cst_57 : f32 to vector<16x256xf32>
      %130 = arith.mulf %129, %128 : vector<16x256xf32>
      %cst_58 = arith.constant 0.707106769 : f32
      %131 = vector.broadcast %cst_58 : f32 to vector<16x256xf32>
      %132 = arith.mulf %128, %131 : vector<16x256xf32>
      %133 = math.erf %132 : vector<16x256xf32>
      %cst_59 = arith.constant 1.000000e+00 : f32
      %134 = vector.broadcast %cst_59 : f32 to vector<16x256xf32>
      %135 = arith.addf %134, %133 : vector<16x256xf32>
      %136 = arith.mulf %130, %135 : vector<16x256xf32>
      %137 = arith.truncf %136 : vector<16x256xf32> to vector<16x256xbf16>
      %c0_60 = arith.constant 0 : index
      %c0_61 = arith.constant 0 : index
      %138 = vector.load %arg10[%c0_60, %c0_61] : memref<16x256xbf16, #tpu.memory_space<vmem>>, vector<16x256xbf16>
      tpu.vector_store %arg10[%c0_60, %c0_61], %137 {strides = array<i32>} : memref<16x256xbf16, #tpu.memory_space<vmem>>, vector<16x256xbf16>,
    } else {
    }
    %c0 = arith.constant 0 : index
    %c0_1 = arith.constant 0 : index
    %3 = vector.load %arg10[%c0, %c0_1] : memref<16x256xbf16, #tpu.memory_space<vmem>>, vector<16x256xbf16>
    %c0_2 = arith.constant 0 : index
    %c0_3 = arith.constant 0 : index
    %4 = vector.load %arg7[%c0_2, %c0_3] : memref<1x128xf32, #tpu.memory_space<vmem>>, vector<1x128xf32>
    %c0_4 = arith.constant 0 : index
    %c0_5 = arith.constant 0 : index
    %5 = vector.load %arg8[%c0_4, %c0_5] : memref<1x128xf32, #tpu.memory_space<vmem>>, vector<1x128xf32>
    %c0_6 = arith.constant 0 : index
    %c0_7 = arith.constant 0 : index
    %6 = vector.load %arg5[%c0_6, %c0_7] : memref<256x512xbf16, #tpu.memory_space<vmem>>, vector<256x128xbf16>
    %cst = arith.constant dense<0.000000e+00> : vector<16x128xf32>
    %7 = tpu.matmul %3, %6, %cst {dimension_numbers = #tpu.dot_dimension_numbers<[1], [0], [0], [1], [0, 0, 1, 1], [], []>} : vector<16x256xbf16>, vector<256x128xbf16>, vector<16x128xf32> -> vector<16x128xf32>
    %c0_8 = arith.constant 0 : index
    %c0_9 = arith.constant 0 : index
    %8 = vector.load %arg6[%c0_8, %c0_9] : memref<1x512xf32, #tpu.memory_space<vmem>>, vector<1x128xf32>
    %9 = vector.broadcast %8 : vector<1x128xf32> to vector<16x128xf32>
    %10 = arith.addf %7, %9 : vector<16x128xf32>
    %cst_10 = arith.constant dense<0.000000e+00> : vector<16xf32>
    %11 = vector.multi_reduction <add>, %10, %cst_10 [1] : vector<16x128xf32> to vector<16xf32>
    %12 = vector.shape_cast %11 : vector<16xf32> to vector<16x1xf32>
    %cst_11 = arith.constant 1.280000e+02 : f32
    %13 = vector.broadcast %cst_11 : f32 to vector<16x1xf32>
    %14 = arith.divf %12, %13 : vector<16x1xf32>
    %15 = arith.mulf %10, %10 : vector<16x128xf32>
    %cst_12 = arith.constant dense<0.000000e+00> : vector<16xf32>
    %16 = vector.multi_reduction <add>, %15, %cst_12 [1] : vector<16x128xf32> to vector<16xf32>
    %17 = vector.shape_cast %16 : vector<16xf32> to vector<16x1xf32>
    %cst_13 = arith.constant 1.280000e+02 : f32
    %18 = vector.broadcast %cst_13 : f32 to vector<16x1xf32>
    %19 = arith.divf %17, %18 : vector<16x1xf32>
    %20 = arith.mulf %14, %14 : vector<16x1xf32>
    %21 = arith.subf %19, %20 : vector<16x1xf32>
    %cst_14 = arith.constant 9.99999974E-6 : f32
    %22 = vector.broadcast %cst_14 : f32 to vector<16x1xf32>
    %23 = arith.addf %21, %22 : vector<16x1xf32>
    %24 = math.rsqrt %23 : vector<16x1xf32>
    %25 = vector.broadcast %24 : vector<16x1xf32> to vector<16x128xf32>
    %26 = vector.broadcast %4 : vector<1x128xf32> to vector<16x128xf32>
    %27 = arith.mulf %25, %26 : vector<16x128xf32>
    %28 = arith.mulf %10, %27 : vector<16x128xf32>
    %29 = vector.broadcast %14 : vector<16x1xf32> to vector<16x128xf32>
    %30 = arith.mulf %29, %27 : vector<16x128xf32>
    %31 = vector.broadcast %5 : vector<1x128xf32> to vector<16x128xf32>
    %32 = arith.subf %31, %30 : vector<16x128xf32>
    %33 = arith.addf %28, %32 : vector<16x128xf32>
    %c0_15 = arith.constant 0 : index
    %c0_16 = arith.constant 0 : index
    %34 = vector.load %arg9[%c0_15, %c0_16] : memref<16x512xf32, #tpu.memory_space<vmem>>, vector<16x128xf32>
    tpu.vector_store %arg9[%c0_15, %c0_16], %33 {strides = array<i32>} : memref<16x512xf32, #tpu.memory_space<vmem>>, vector<16x128xf32>,
    %c0_17 = arith.constant 0 : index
    %c128 = arith.constant 128 : index
    %35 = vector.load %arg5[%c0_17, %c128] : memref<256x512xbf16, #tpu.memory_space<vmem>>, vector<256x128xbf16>
    %cst_18 = arith.constant dense<0.000000e+00> : vector<16x128xf32>
    %36 = tpu.matmul %3, %35, %cst_18 {dimension_numbers = #tpu.dot_dimension_numbers<[1], [0], [0], [1], [0, 0, 1, 1], [], []>} : vector<16x256xbf16>, vector<256x128xbf16>, vector<16x128xf32> -> vector<16x128xf32>
    %c0_19 = arith.constant 0 : index
    %c128_20 = arith.constant 128 : index
    %37 = vector.load %arg6[%c0_19, %c128_20] : memref<1x512xf32, #tpu.memory_space<vmem>>, vector<1x128xf32>
    %38 = vector.broadcast %37 : vector<1x128xf32> to vector<16x128xf32>
    %39 = arith.addf %36, %38 : vector<16x128xf32>
    %cst_21 = arith.constant dense<0.000000e+00> : vector<16xf32>
    %40 = vector.multi_reduction <add>, %39, %cst_21 [1] : vector<16x128xf32> to vector<16xf32>
    %41 = vector.shape_cast %40 : vector<16xf32> to vector<16x1xf32>
    %cst_22 = arith.constant 1.280000e+02 : f32
    %42 = vector.broadcast %cst_22 : f32 to vector<16x1xf32>
    %43 = arith.divf %41, %42 : vector<16x1xf32>
    %44 = arith.mulf %39, %39 : vector<16x128xf32>
    %cst_23 = arith.constant dense<0.000000e+00> : vector<16xf32>
    %45 = vector.multi_reduction <add>, %44, %cst_23 [1] : vector<16x128xf32> to vector<16xf32>
    %46 = vector.shape_cast %45 : vector<16xf32> to vector<16x1xf32>
    %cst_24 = arith.constant 1.280000e+02 : f32
    %47 = vector.broadcast %cst_24 : f32 to vector<16x1xf32>
    %48 = arith.divf %46, %47 : vector<16x1xf32>
    %49 = arith.mulf %43, %43 : vector<16x1xf32>
    %50 = arith.subf %48, %49 : vector<16x1xf32>
    %cst_25 = arith.constant 9.99999974E-6 : f32
    %51 = vector.broadcast %cst_25 : f32 to vector<16x1xf32>
    %52 = arith.addf %50, %51 : vector<16x1xf32>
    %53 = math.rsqrt %52 : vector<16x1xf32>
    %54 = vector.broadcast %53 : vector<16x1xf32> to vector<16x128xf32>
    %55 = vector.broadcast %4 : vector<1x128xf32> to vector<16x128xf32>
    %56 = arith.mulf %54, %55 : vector<16x128xf32>
    %57 = arith.mulf %39, %56 : vector<16x128xf32>
    %58 = vector.broadcast %43 : vector<16x1xf32> to vector<16x128xf32>
    %59 = arith.mulf %58, %56 : vector<16x128xf32>
    %60 = vector.broadcast %5 : vector<1x128xf32> to vector<16x128xf32>
    %61 = arith.subf %60, %59 : vector<16x128xf32>
    %62 = arith.addf %57, %61 : vector<16x128xf32>
    %c0_26 = arith.constant 0 : index
    %c128_27 = arith.constant 128 : index
    %63 = vector.load %arg9[%c0_26, %c128_27] : memref<16x512xf32, #tpu.memory_space<vmem>>, vector<16x128xf32>
    tpu.vector_store %arg9[%c0_26, %c128_27], %62 {strides = array<i32>} : memref<16x512xf32, #tpu.memory_space<vmem>>, vector<16x128xf32>,
    %c0_28 = arith.constant 0 : index
    %c256 = arith.constant 256 : index
    %64 = vector.load %arg5[%c0_28, %c256] : memref<256x512xbf16, #tpu.memory_space<vmem>>, vector<256x128xbf16>
    %cst_29 = arith.constant dense<0.000000e+00> : vector<16x128xf32>
    %65 = tpu.matmul %3, %64, %cst_29 {dimension_numbers = #tpu.dot_dimension_numbers<[1], [0], [0], [1], [0, 0, 1, 1], [], []>} : vector<16x256xbf16>, vector<256x128xbf16>, vector<16x128xf32> -> vector<16x128xf32>
    %c0_30 = arith.constant 0 : index
    %c256_31 = arith.constant 256 : index
    %66 = vector.load %arg6[%c0_30, %c256_31] : memref<1x512xf32, #tpu.memory_space<vmem>>, vector<1x128xf32>
    %67 = vector.broadcast %66 : vector<1x128xf32> to vector<16x128xf32>
    %68 = arith.addf %65, %67 : vector<16x128xf32>
    %cst_32 = arith.constant dense<0.000000e+00> : vector<16xf32>
    %69 = vector.multi_reduction <add>, %68, %cst_32 [1] : vector<16x128xf32> to vector<16xf32>
    %70 = vector.shape_cast %69 : vector<16xf32> to vector<16x1xf32>
    %cst_33 = arith.constant 1.280000e+02 : f32
    %71 = vector.broadcast %cst_33 : f32 to vector<16x1xf32>
    %72 = arith.divf %70, %71 : vector<16x1xf32>
    %73 = arith.mulf %68, %68 : vector<16x128xf32>
    %cst_34 = arith.constant dense<0.000000e+00> : vector<16xf32>
    %74 = vector.multi_reduction <add>, %73, %cst_34 [1] : vector<16x128xf32> to vector<16xf32>
    %75 = vector.shape_cast %74 : vector<16xf32> to vector<16x1xf32>
    %cst_35 = arith.constant 1.280000e+02 : f32
    %76 = vector.broadcast %cst_35 : f32 to vector<16x1xf32>
    %77 = arith.divf %75, %76 : vector<16x1xf32>
    %78 = arith.mulf %72, %72 : vector<16x1xf32>
    %79 = arith.subf %77, %78 : vector<16x1xf32>
    %cst_36 = arith.constant 9.99999974E-6 : f32
    %80 = vector.broadcast %cst_36 : f32 to vector<16x1xf32>
    %81 = arith.addf %79, %80 : vector<16x1xf32>
    %82 = math.rsqrt %81 : vector<16x1xf32>
    %83 = vector.broadcast %82 : vector<16x1xf32> to vector<16x128xf32>
    %84 = vector.broadcast %4 : vector<1x128xf32> to vector<16x128xf32>
    %85 = arith.mulf %83, %84 : vector<16x128xf32>
    %86 = arith.mulf %68, %85 : vector<16x128xf32>
    %87 = vector.broadcast %72 : vector<16x1xf32> to vector<16x128xf32>
    %88 = arith.mulf %87, %85 : vector<16x128xf32>
    %89 = vector.broadcast %5 : vector<1x128xf32> to vector<16x128xf32>
    %90 = arith.subf %89, %88 : vector<16x128xf32>
    %91 = arith.addf %86, %90 : vector<16x128xf32>
    %c0_37 = arith.constant 0 : index
    %c256_38 = arith.constant 256 : index
    %92 = vector.load %arg9[%c0_37, %c256_38] : memref<16x512xf32, #tpu.memory_space<vmem>>, vector<16x128xf32>
    tpu.vector_store %arg9[%c0_37, %c256_38], %91 {strides = array<i32>} : memref<16x512xf32, #tpu.memory_space<vmem>>, vector<16x128xf32>,
    %c0_39 = arith.constant 0 : index
    %c384 = arith.constant 384 : index
    %93 = vector.load %arg5[%c0_39, %c384] : memref<256x512xbf16, #tpu.memory_space<vmem>>, vector<256x128xbf16>
    %cst_40 = arith.constant dense<0.000000e+00> : vector<16x128xf32>
    %94 = tpu.matmul %3, %93, %cst_40 {dimension_numbers = #tpu.dot_dimension_numbers<[1], [0], [0], [1], [0, 0, 1, 1], [], []>} : vector<16x256xbf16>, vector<256x128xbf16>, vector<16x128xf32> -> vector<16x128xf32>
    %c0_41 = arith.constant 0 : index
    %c384_42 = arith.constant 384 : index
    %95 = vector.load %arg6[%c0_41, %c384_42] : memref<1x512xf32, #tpu.memory_space<vmem>>, vector<1x128xf32>
    %96 = vector.broadcast %95 : vector<1x128xf32> to vector<16x128xf32>
    %97 = arith.addf %94, %96 : vector<16x128xf32>
    %cst_43 = arith.constant dense<0.000000e+00> : vector<16xf32>
    %98 = vector.multi_reduction <add>, %97, %cst_43 [1] : vector<16x128xf32> to vector<16xf32>
    %99 = vector.shape_cast %98 : vector<16xf32> to vector<16x1xf32>
    %cst_44 = arith.constant 1.280000e+02 : f32
    %100 = vector.broadcast %cst_44 : f32 to vector<16x1xf32>
    %101 = arith.divf %99, %100 : vector<16x1xf32>
    %102 = arith.mulf %97, %97 : vector<16x128xf32>
    %cst_45 = arith.constant dense<0.000000e+00> : vector<16xf32>
    %103 = vector.multi_reduction <add>, %102, %cst_45 [1] : vector<16x128xf32> to vector<16xf32>
    %104 = vector.shape_cast %103 : vector<16xf32> to vector<16x1xf32>
    %cst_46 = arith.constant 1.280000e+02 : f32
    %105 = vector.broadcast %cst_46 : f32 to vector<16x1xf32>
    %106 = arith.divf %104, %105 : vector<16x1xf32>
    %107 = arith.mulf %101, %101 : vector<16x1xf32>
    %108 = arith.subf %106, %107 : vector<16x1xf32>
    %cst_47 = arith.constant 9.99999974E-6 : f32
    %109 = vector.broadcast %cst_47 : f32 to vector<16x1xf32>
    %110 = arith.addf %108, %109 : vector<16x1xf32>
    %111 = math.rsqrt %110 : vector<16x1xf32>
    %112 = vector.broadcast %111 : vector<16x1xf32> to vector<16x128xf32>
    %113 = vector.broadcast %4 : vector<1x128xf32> to vector<16x128xf32>
    %114 = arith.mulf %112, %113 : vector<16x128xf32>
    %115 = arith.mulf %97, %114 : vector<16x128xf32>
    %116 = vector.broadcast %101 : vector<16x1xf32> to vector<16x128xf32>
    %117 = arith.mulf %116, %114 : vector<16x128xf32>
    %118 = vector.broadcast %5 : vector<1x128xf32> to vector<16x128xf32>
    %119 = arith.subf %118, %117 : vector<16x128xf32>
    %120 = arith.addf %115, %119 : vector<16x128xf32>
    %c0_48 = arith.constant 0 : index
    %c384_49 = arith.constant 384 : index
    %121 = vector.load %arg9[%c0_48, %c384_49] : memref<16x512xf32, #tpu.memory_space<vmem>>, vector<16x128xf32>
    tpu.vector_store %arg9[%c0_48, %c384_49], %120 {strides = array<i32>} : memref<16x512xf32, #tpu.memory_space<vmem>>, vector<16x128xf32>,
    return
  }
  func.func @transform_0(%arg0: i32, %arg1: i32) -> (i32, i32) {
    %c0_i32 = arith.constant 0 : i32
    %c0_i32_0 = arith.constant 0 : i32
    return %arg0, %c0_i32 : i32, i32
  }
  func.func @transform_1(%arg0: i32, %arg1: i32) -> (i32, i32) {
    %c0_i32 = arith.constant 0 : i32
    %c0_i32_0 = arith.constant 0 : i32
    %c0_i32_1 = arith.constant 0 : i32
    return %c0_i32, %c0_i32_0 : i32, i32
  }
  func.func @transform_2(%arg0: i32, %arg1: i32) -> (i32, i32) {
    %c0_i32 = arith.constant 0 : i32
    %c0_i32_0 = arith.constant 0 : i32
    %c0_i32_1 = arith.constant 0 : i32
    return %c0_i32, %c0_i32_0 : i32, i32
  }
  func.func @transform_3(%arg0: i32, %arg1: i32) -> (i32, i32) {
    %c0_i32 = arith.constant 0 : i32
    %c0_i32_0 = arith.constant 0 : i32
    return %c0_i32, %arg1 : i32, i32
  }
  func.func @transform_4(%arg0: i32, %arg1: i32) -> (i32, i32) {
    %c0_i32 = arith.constant 0 : i32
    %c0_i32_0 = arith.constant 0 : i32
    return %c0_i32, %arg1 : i32, i32
  }
  func.func @transform_5(%arg0: i32, %arg1: i32) -> (i32, i32) {
    %c0_i32 = arith.constant 0 : i32
    %c0_i32_0 = arith.constant 0 : i32
    %c0_i32_1 = arith.constant 0 : i32
    return %c0_i32, %c0_i32_0 : i32, i32
  }
  func.func @transform_6(%arg0: i32, %arg1: i32) -> (i32, i32) {
    %c0_i32 = arith.constant 0 : i32
    %c0_i32_0 = arith.constant 0 : i32
    %c0_i32_1 = arith.constant 0 : i32
    return %c0_i32, %c0_i32_0 : i32, i32
  }
  func.func @transform_7(%arg0: i32, %arg1: i32) -> (i32, i32) {
    %c0_i32 = arith.constant 0 : i32
    return %arg0, %arg1 : i32, i32
  }
}

</mosaic_0001>

<bundles_post_ra>
// kernel: tpu_custom_call.1
= control target key start
LH: loop header
LB: loop body
LE: loop exit
PB: predicated region body
PF: predicated region fallthrough
CT: control target
= control target key end

     0   :  { %12 = vsyncpa [#allocation4], 0  ;;  %s2362_s0 = inlined_call_operand.hbm [shape: f32[16,128], index: 0, kind: input, shape index: {}]   ;;  %s2363_s1 = inlined_call_operand.hbm [shape: bf16[128,256], index: 1, kind: input, shape index: {}]   ;;  %s2364_s2 = inlined_call_operand.hbm [shape: f32[1,256], index: 2, kind: input, shape index: {}]   ;;  %s2365_s3 = inlined_call_operand.hbm [shape: bf16[256,512], index: 3, kind: input, shape index: {}]   ;;  %s2366_s4 = inlined_call_operand.hbm [shape: f32[1,512], index: 4, kind: input, shape index: {}]   ;;  %s2367_s5 = inlined_call_operand.vmem [shape: f32[1,128], index: 5, kind: input, shape index: {}]   ;;  %s2368_s6 = inlined_call_operand.vmem [shape: f32[1,128], index: 6, kind: input, shape index: {}]   ;;  %s2369_s7 = inlined_call_operand.hbm [shape: f32[16,512], index: 7, kind: output, shape index: {}]  }
   0x1   :  { %13 = vsyncpa [#allocation7], 0 }
   0x2   :  { %14 = vsyncpa [#allocation10], 0 }
   0x3   :  { %15 = vsyncpa [#allocation5], 0  ;;  %s33_s26 = sshll.u32 %s2363_s1, 4  ;;  %s1925_s27 = smov [#allocation6]   ;;  %s34_s26 = int_to_ptr.hbm [resolvable:$true] %s33_s26 }
   0x4   :  { %s35_s28 = sshll.u32 %s1925_s27, 4  ;;  %s57_s8 = sshll.u32 %s2365_s3, 4  ;;  %s36_s28 = int_to_ptr.vmem [resolvable:$true] %s35_s28  ;;  %s58_s8 = int_to_ptr.hbm [resolvable:$true] %s57_s8 }
   0x5   :  { %s1926_s9 = smov 128   ;;  %s1927_s10 = smov 8  }
   0x6   :  { %41 = dma.hbm_to_vmem [thread:$0]  %s34_s26, 2048, %s36_s28, [#allocation7], %s1926_s9, %s1926_s9, %s1927_s10  }
   0x7   :  { %s1928_s11 = smov [#allocation9]   ;;  %s1929_s13 = smov 256  }
   0x8   :  { %s59_s12 = sshll.u32 %s1928_s11, 4  ;;  %s1930_s14 = smov 16   ;;  %s60_s12 = int_to_ptr.vmem [resolvable:$true] %s59_s12 }
   0x9   :  { %65 = dma.hbm_to_vmem [thread:$0]  %s58_s8, 8192, %s60_s12, [#allocation10], %s1929_s13, %s1929_s13, %s1930_s14  }
   0xa   :  { %s20_s16 = sshll.u32 %s2362_s0, 4  ;;  %s1931_s17 = smov [#allocation3]   ;;  %s21_s16 = int_to_ptr.hbm [resolvable:$true] %s20_s16 }
   0xb   :  { %s22_s18 = sshll.u32 %s1931_s17, 4  ;;  %s47_s20 = sshll.u32 %s2364_s2, 4  ;;  %s23_s18 = int_to_ptr.vmem [resolvable:$true] %s22_s18  ;;  %s48_s20 = int_to_ptr.hbm [resolvable:$true] %s47_s20 }
   0xc   :  { %28 = dma.hbm_to_vmem [thread:$0]  %s21_s16, 256, %s23_s18, [#allocation4], %s1926_s9, %s1926_s9, %s1927_s10  }
   0xd   :  { %s1932_s21 = smov [#allocation8]   ;;  %s71_s25 = sshll.u32 %s2366_s4, 4  ;;  %s72_s25 = int_to_ptr.hbm [resolvable:$true] %s71_s25 }
   0xe   :  { %s49_s22 = sshll.u32 %s1932_s21, 4  ;;  %s1933_s0 = smov [#allocation11]   ;;  %s50_s22 = int_to_ptr.vmem [resolvable:$true] %s49_s22 }
   0xf   :  { %52 = dma.hbm_to_vmem [thread:$0]  %s48_s20, 32, %s50_s22, [#allocation7]  }
  0x10   :  { %s73_s26 = sshll.u32 %s1933_s0, 4  ;;  %s74_s26 = int_to_ptr.vmem [resolvable:$true] %s73_s26 }
  0x11   :  { %76 = dma.hbm_to_vmem [thread:$0]  %s72_s25, 64, %s74_s26, [#allocation10]  }
  0x12   :  { %1917 = dma.done.wait [#allocation4], 256  }
  0x13   :  { %1918 = vsyncadd [#allocation4], 4294967040 }
  0x14   :  { %1919 = dma.done.wait [#allocation7], 2080  }
  0x15   :  { %1920 = vsyncadd [#allocation7], 4294965216 }
  0x16   :  { %1921 = dma.done.wait [#allocation10], 8256  }
  0x17   :  { %1922 = vsyncadd [#allocation10], 4294959040  ;;  %v1372_v0 = vld [vmem:[#allocation6 + $0x70] sm:$0xf]  ;;  %v1661_v1 = vld [vmem:[#allocation6 + $0x74] sm:$0xf0] }
  0x18   :  { %v1660_v2 = vld [vmem:[#allocation6 + $0x74] sm:$0xf]  ;;  %v1373_v3 = vor.u32 %v1661_v1, %v1372_v0  ;;  %v1374_v4 = vld [vmem:[#allocation6 + $0x78] sm:$0xf0]  ;;  %v1364_v5 = vld [vmem:[#allocation6 + $0x60] sm:$0xf] }
  0x19   :  { %v1659_v6 = vld [vmem:[#allocation6 + $0x64] sm:$0xf0]  ;;  %v1377_v7 = vor.u32 %v1660_v2, %v1374_v4  ;;  %v1658_v8 = vld [vmem:[#allocation6 + $0x64] sm:$0xf]  ;;  %v1366_v9 = vld [vmem:[#allocation6 + $0x68] sm:$0xf0] }
  0x1a   :  { %210 = vmatpush.bf16.msra.mxu0 %v1373_v3  ;;  %v1365_v10 = vor.u32 %v1659_v6, %v1364_v5  ;;  %v1369_v11 = vor.u32 %v1658_v8, %v1366_v9  ;;  %v1356_v12 = vld [vmem:[#allocation6 + $0x50] sm:$0xf]  ;;  %v1657_v13 = vld [vmem:[#allocation6 + $0x54] sm:$0xf0]  ;;  %v1656_v14 = vld [vmem:[#allocation6 + $0x54] sm:$0xf] }
  0x1b   :  { %224 = vmatpush.bf16.msra.mxu1 %v1377_v7  ;;  %v1358_v15 = vld [vmem:[#allocation6 + $0x58] sm:$0xf0]  ;;  %v1357_v16 = vor.u32 %v1657_v13, %v1356_v12  ;;  %v1348_v18 = vld [vmem:[#allocation6 + $0x40] sm:$0xf]  ;;  %v1655_v19 = vld [vmem:[#allocation6 + $0x44] sm:$0xf0] }
  0x1c   :  { %v1361_v17 = vor.u32 %v1656_v14, %v1358_v15  ;;  %v1654_v20 = vld [vmem:[#allocation6 + $0x44] sm:$0xf]  ;;  %v1350_v21 = vld [vmem:[#allocation6 + $0x48] sm:$0xf0]  ;;  %v1340_v22 = vld [vmem:[#allocation6 + $0x30] sm:$0xf]  ;;  %v1349_v23 = vor.u32 %v1655_v19, %v1348_v18 }
  0x1d   :  { %v1653_v24 = vld [vmem:[#allocation6 + $0x34] sm:$0xf0]  ;;  %v1652_v25 = vld [vmem:[#allocation6 + $0x34] sm:$0xf]  ;;  %v1353_v26 = vor.u32 %v1654_v20, %v1350_v21  ;;  %v1342_v27 = vld [vmem:[#allocation6 + $0x38] sm:$0xf0] }
  0x1e   :  { %211 = vmatpush.bf16.msra.mxu0 %v1365_v10  ;;  %v1341_v28 = vor.u32 %v1653_v24, %v1340_v22  ;;  %v1345_v29 = vor.u32 %v1652_v25, %v1342_v27  ;;  %v1332_v30 = vld [vmem:[#allocation6 + $0x20] sm:$0xf]  ;;  %v1651_v31 = vld [vmem:[#allocation6 + $0x24] sm:$0xf0]  ;;  %v1650_v32 = vld [vmem:[#allocation6 + $0x24] sm:$0xf] }
  0x1f   :  { %225 = vmatpush.bf16.msra.mxu1 %v1369_v11  ;;  %v1334_v33 = vld [vmem:[#allocation6 + $0x28] sm:$0xf0]  ;;  %v1333_v34 = vor.u32 %v1651_v31, %v1332_v30  ;;  %v1324_v36 = vld [vmem:[#allocation6 + $0x10] sm:$0xf]  ;;  %v1649_v37 = vld [vmem:[#allocation6 + $0x14] sm:$0xf0] }
  0x20   :  { %v1337_v35 = vor.u32 %v1650_v32, %v1334_v33  ;;  %v1648_v38 = vld [vmem:[#allocation6 + $0x14] sm:$0xf]  ;;  %v1326_v39 = vld [vmem:[#allocation6 + $0x18] sm:$0xf0]  ;;  %v1325_v40 = vor.u32 %v1649_v37, %v1324_v36  ;;  %v1316_v42 = vld [vmem:[#allocation6] sm:$0xf] }
  0x21   :  { %v1329_v41 = vor.u32 %v1648_v38, %v1326_v39  ;;  %v1647_v43 = vld [vmem:[#allocation6 + $0x4] sm:$0xf0]  ;;  %v1646_v44 = vld [vmem:[#allocation6 + $0x4] sm:$0xf]  ;;  %v1318_v45 = vld [vmem:[#allocation6 + $0x8] sm:$0xf0] }
  0x22   :  { %212 = vmatpush.bf16.msra.mxu0 %v1357_v16  ;;  %v1317_v46 = vor.u32 %v1647_v43, %v1316_v42  ;;  %v105_v47 = vld [vmem:[#allocation3] sm:$0xff]  ;;  %v106_v48 = vld [vmem:[#allocation3 + $0x8] sm:$0xff]  ;;  %v1321_v49 = vor.u32 %v1646_v44, %v1318_v45  ;;  %v124_v51 = vld [vmem:[#allocation8] sm:$0x3]  ;;  %s1299_s8 = sshll.u32 %s2369_s7, 4  ;;  %s1936_s9 = smov 512   ;;  %s1300_s8 = int_to_ptr.hbm [resolvable:$true] %s1299_s8 }
  0x23   :  { %226 = vmatpush.bf16.msra.mxu1 %v1361_v17  ;;  %v107_v50 = vpack.c.bf16 %v106_v48, %v105_v47  ;;  %v126_v52 = vperm.slane %v124_v51, 0  ;;  %v127_v53 = vperm.slane %v124_v51, 1  ;;  %v1420_v62 = vld [vmem:[#allocation9 + $0xe0] sm:$0xf]  ;;  %v1671_v63 = vld [vmem:[#allocation9 + $0xec] sm:$0xf0] }
  0x24   :  { %v1452_v0 = vld [vmem:[#allocation9 + $0x1e0] sm:$0xf]  ;;  %v1421_v2 = vor.u32 %v1671_v63, %v1420_v62  ;;  %v1679_v3 = vld [vmem:[#allocation9 + $0x1ec] sm:$0xf0]  ;;  %v1484_v4 = vld [vmem:[#allocation9 + $0xe4] sm:$0xf] }
  0x25   :  { %v1453_v7 = vor.u32 %v1679_v3, %v1452_v0  ;;  %v1687_v8 = vld [vmem:[#allocation9 + $0xf0] sm:$0xf0]  ;;  %v1516_v9 = vld [vmem:[#allocation9 + $0x1e4] sm:$0xf]  ;;  %v1416_v22 = vld [vmem:[#allocation9 + $0xc0] sm:$0xf] }
  0x26   :  { %213 = vmatpush.bf16.msra.mxu0 %v1349_v23  ;;  %564 = vmatpush.bf16.msra.mxu2 %v1421_v2  ;;  %v1485_v14 = vor.u32 %v1687_v8, %v1484_v4  ;;  %v1695_v15 = vld [vmem:[#allocation9 + $0x1f0] sm:$0xf0]  ;;  %v1480_v36 = vld [vmem:[#allocation9 + $0xc4] sm:$0xf]  ;;  %v1412_v63 = vld [vmem:[#allocation9 + $0xa0] sm:$0xf] }
  0x27   :  { %227 = vmatpush.bf16.msra.mxu1 %v1353_v26  ;;  %578 = vmatpush.bf16.msra.mxu3 %v1453_v7  ;;  %v1517_v19 = vor.u32 %v1695_v15, %v1516_v9  ;;  %v1669_v9 = vld [vmem:[#allocation9 + $0xac] sm:$0xf0]  ;;  %s1937_s10 = smov 32  }
  0x2a   :  { %214 = vmatpush.bf16.msra.mxu0 %v1341_v28 }
  0x2b   :  { %228 = vmatpush.bf16.msra.mxu1 %v1345_v29  ;;  %v1670_v29 = vld [vmem:[#allocation9 + $0xcc] sm:$0xf0] }
  0x2c   :  { %v1417_v33 = vor.u32 %v1670_v29, %v1416_v22 }
  0x2e   :  { %215 = vmatpush.bf16.msra.mxu0 %v1333_v34  ;;  %v1448_v34 = vld [vmem:[#allocation9 + $0x1c0] sm:$0xf]  ;;  %565 = vmatpush.bf16.msra.mxu2 %v1417_v33 }
  0x2f   :  { %229 = vmatpush.bf16.msra.mxu1 %v1337_v35  ;;  %v1678_v35 = vld [vmem:[#allocation9 + $0x1cc] sm:$0xf0] }
  0x32   :  { %216 = vmatpush.bf16.msra.mxu0 %v1325_v40  ;;  %v1449_v40 = vor.u32 %v1678_v35, %v1448_v34  ;;  %v1444_v35 = vld [vmem:[#allocation9 + $0x1a0] sm:$0xf] }
  0x33   :  { %230 = vmatpush.bf16.msra.mxu1 %v1329_v41  ;;  %v1686_v41 = vld [vmem:[#allocation9 + $0xd0] sm:$0xf0] }
  0x34   :  { %v1481_v45 = vor.u32 %v1686_v41, %v1480_v36  ;;  %579 = vmatpush.bf16.msra.mxu3 %v1449_v40 }
  0x36   :  { %217 = vmatpush.bf16.msra.mxu0 %v1317_v46 }
  0x37   :  { %231 = vmatpush.bf16.msra.mxu1 %v1321_v49  ;;  %v1512_v49 = vld [vmem:[#allocation9 + $0x1c4] sm:$0xf] }
  0x39   :  { %218 = vmatmul.bf16.vlgmr.msra.gmra.mxu0 %v107_v50 }
  0x3a   :  { %232 = vmatmul.bf16.vlgmr.msra.gmra.mxu1 %v107_v50  ;;  %789 = vmatpush.bf16.msrb.mxu0 %v1485_v14  ;;  %v1694_v50 = vld [vmem:[#allocation9 + $0x1d0] sm:$0xf0] }
  0x3b   :  { %803 = vmatpush.bf16.msrb.mxu1 %v1517_v19  ;;  %v1513_v62 = vor.u32 %v1694_v50, %v1512_v49  ;;  %v1408_v50 = vld [vmem:[#allocation9 + $0x80] sm:$0xf] }
  0x3e   :  { %790 = vmatpush.bf16.msrb.mxu0 %v1481_v45  ;;  %v1508_v45 = vld [vmem:[#allocation9 + $0x1a4] sm:$0xf] }
  0x3f   :  { %804 = vmatpush.bf16.msrb.mxu1 %v1513_v62 }
  0xb6   :  { %v219_v54 = vpop.f32.mrf.mxu0 }
  0xb7   :  { %v1993_v55 = vadd.f32 %v219_v54, %v126_v52  ;;  %v233_v56 = vpop.f32.mrf.mxu1 }
  0xb8   :  { %v1995_v57 = vadd.f32 %v233_v56, %v127_v53 }
  0xb9   :  { %v1998_v58 = vmul.f32 0.70710677, %v1993_v55 }
  0xba   :  { %v2001_v59 = vmul.f32 0.70710677, %v1995_v57 }
  0xbb   :  { %v246_v60 = vmul.f32 %v1998_v58, %v1998_v58 }
  0xbc   :  { %v286_v61 = vmul.f32 %v2001_v59, %v2001_v59 }
  0xbd   :  { %v2007_v1 = vmin.f32 %v246_v60, 16.0 }
  0xbe   :  { %v2009_v5 = vmin.f32 %v286_v61, 16.0  ;;  %v221_v6 = vpop.f32.mrf.mxu0 }
  0xbf   :  { %v248_v10 = vmul.f32 2.1237322e-06, %v2007_v1  ;;  %v259_v11 = vmul.f32 3.8918573e-05, %v2007_v1  ;;  %v2013_v12 = vadd.f32 %v221_v6, %v126_v52  ;;  %v235_v13 = vpop.f32.mrf.mxu1 }
  0xc0   :  { %v288_v16 = vmul.f32 2.1237322e-06, %v2009_v5  ;;  %v299_v17 = vmul.f32 3.8918573e-05, %v2009_v5  ;;  %v2017_v18 = vadd.f32 %v235_v13, %v127_v53 }
  0xc1   :  { %v249_v20 = vadd.f32 0.00028619796, %v248_v10  ;;  %v260_v21 = vadd.f32 0.001143296, %v259_v11  ;;  %v2020_v25 = vmul.f32 0.70710677, %v2013_v12 }
  0xc2   :  { %v289_v23 = vadd.f32 0.00028619796, %v288_v16  ;;  %v300_v24 = vadd.f32 0.001143296, %v299_v17  ;;  %v2025_v28 = vmul.f32 0.70710677, %v2017_v18 }
  0xc3   :  { %v250_v26 = vmul.f32 %v249_v20, %v2007_v1  ;;  %v261_v27 = vmul.f32 %v260_v21, %v2007_v1  ;;  %v326_v32 = vmul.f32 %v2020_v25, %v2020_v25 }
  0xc4   :  { %v290_v30 = vmul.f32 %v289_v23, %v2009_v5  ;;  %v301_v31 = vmul.f32 %v300_v24, %v2009_v5  ;;  %v366_v39 = vmul.f32 %v2025_v28, %v2025_v28  ;;  %v1413_v23 = vor.u32 %v1669_v9, %v1412_v63 }
  0xc5   :  { %v251_v37 = vadd.f32 0.0036580483, %v250_v26  ;;  %v262_v38 = vadd.f32 0.014752088, %v261_v27  ;;  %v2033_v44 = vmin.f32 %v326_v32, 16.0 }
  0xc6   :  { %v291_v42 = vadd.f32 0.0036580483, %v290_v30  ;;  %v302_v43 = vadd.f32 0.014752088, %v301_v31  ;;  %v2037_v48 = vmin.f32 %v366_v39, 16.0  ;;  %566 = vmatpush.bf16.msra.mxu2 %v1413_v23 }
  0xc7   :  { %v252_v46 = vmul.f32 %v251_v37, %v2007_v1  ;;  %v263_v47 = vmul.f32 %v262_v38, %v2007_v1  ;;  %v328_v53 = vmul.f32 2.1237322e-06, %v2033_v44  ;;  %v339_v54 = vmul.f32 3.8918573e-05, %v2033_v44  ;;  %v1677_v39 = vld [vmem:[#allocation9 + $0x1ac] sm:$0xf0] }
  0xc8   :  { %v292_v51 = vmul.f32 %v291_v42, %v2009_v5  ;;  %v303_v52 = vmul.f32 %v302_v43, %v2009_v5  ;;  %v368_v61 = vmul.f32 2.1237322e-06, %v2037_v48  ;;  %v379_v14 = vmul.f32 3.8918573e-05, %v2037_v48  ;;  %v1476_v42 = vld [vmem:[#allocation9 + $0xa4] sm:$0xf] }
  0xc9   :  { %v253_v56 = vadd.f32 0.05243302, %v252_v46  ;;  %v264_v60 = vadd.f32 0.112945676, %v263_v47  ;;  %v329_v3 = vadd.f32 0.00028619796, %v328_v53 }
  0xca   :  { %v293_v0 = vadd.f32 0.05243302, %v292_v51  ;;  %v304_v2 = vadd.f32 0.112945676, %v303_v52  ;;  %v340_v7 = vadd.f32 0.001143296, %v339_v54 }
  0xcb   :  { %v254_v4 = vmul.f32 %v253_v56, %v2007_v1  ;;  %v265_v6 = vmul.f32 %v264_v60, %v2007_v1  ;;  %v369_v8 = vadd.f32 0.00028619796, %v368_v61  ;;  %v330_v13 = vmul.f32 %v329_v3, %v2033_v44  ;;  %v1685_v43 = vld [vmem:[#allocation9 + $0xb0] sm:$0xf0]  ;;  %v1668_v51 = vld [vmem:[#allocation9 + $0x8c] sm:$0xf0] }
  0xcc   :  { %v294_v10 = vmul.f32 %v293_v0, %v2009_v5  ;;  %v305_v11 = vmul.f32 %v304_v2, %v2009_v5  ;;  %v341_v17 = vmul.f32 %v340_v7, %v2033_v44  ;;  %v380_v33 = vadd.f32 0.001143296, %v379_v14  ;;  %v1693_v46 = vld [vmem:[#allocation9 + $0x1b0] sm:$0xf0]  ;;  %v1440_v56 = vld [vmem:[#allocation9 + $0x180] sm:$0xf] }
  0xcd   :  { %v255_v15 = vadd.f32 0.18741608, %v254_v4  ;;  %v266_v16 = vadd.f32 0.4994258, %v265_v6  ;;  %v370_v19 = vmul.f32 %v369_v8, %v2037_v48  ;;  %v331_v22 = vadd.f32 0.0036580483, %v330_v13 }
  0xce   :  { %v295_v20 = vadd.f32 0.18741608, %v294_v10  ;;  %v306_v21 = vadd.f32 0.4994258, %v305_v11  ;;  %v342_v27 = vadd.f32 0.014752088, %v341_v17  ;;  %v381_v41 = vmul.f32 %v380_v33, %v2037_v48 }
  0xcf   :  { %v256_v24 = vmul.f32 %v255_v15, %v2007_v1  ;;  %v267_v26 = vmul.f32 %v266_v16, %v2007_v1  ;;  %v371_v29 = vadd.f32 0.0036580483, %v370_v19  ;;  %v332_v32 = vmul.f32 %v331_v22, %v2033_v44  ;;  %v1676_v60 = vld [vmem:[#allocation9 + $0x18c] sm:$0xf0]  ;;  %v1472_v10 = vld [vmem:[#allocation9 + $0x84] sm:$0xf] }
  0xd0   :  { %v296_v30 = vmul.f32 %v295_v20, %v2009_v5  ;;  %v307_v31 = vmul.f32 %v306_v21, %v2009_v5  ;;  %v343_v38 = vmul.f32 %v342_v27, %v2033_v44  ;;  %v2073_v52 = vmul.f32 0.5, %v1993_v55  ;;  %v1684_v11 = vld [vmem:[#allocation9 + $0x90] sm:$0xf0]  ;;  %v1504_v17 = vld [vmem:[#allocation9 + $0x184] sm:$0xf] }
  0xd1   :  { %v2057_v34 = vadd.f32 1.0, %v267_v26  ;;  %v333_v37 = vadd.f32 0.05243302, %v332_v32  ;;  %v372_v1 = vmul.f32 %v371_v29, %v2037_v48  ;;  %v2063_v40 = vadd.f32 1.1283791, %v256_v24 }
  0xd2   :  { %v2059_v36 = vadd.f32 1.0, %v307_v31  ;;  %v2066_v5 = vadd.f32 1.1283791, %v296_v30  ;;  %v344_v62 = vadd.f32 0.112945676, %v343_v38  ;;  %v1445_v0 = vor.u32 %v1677_v39, %v1444_v35 }
  0xd3   :  { %1747 = vrcp.f32 %v2057_v34  ;;  %v278_v47 = vand.u32 2147483647, %v2057_v34  ;;  %v280_v49 = vand.u32 2147483648, %v2057_v34  ;;  %v334_v54 = vmul.f32 %v333_v37, %v2033_v44  ;;  %v1692_v19 = vld [vmem:[#allocation9 + $0x190] sm:$0xf0] }
  0xd4   :  { %1749 = vrcp.f32 %v2059_v36  ;;  %v320_v53 = vand.u32 2147483648, %v2059_v36  ;;  %v318_v61 = vand.u32 2147483647, %v2059_v36  ;;  %v373_v63 = vadd.f32 0.05243302, %v372_v1  ;;  %580 = vmatpush.bf16.msra.mxu3 %v1445_v0 }
  0xd5   :  { %v2078_v2 = vor.u32 1.1754944e-38, %v280_v49  ;;  %v335_v4 = vadd.f32 0.18741608, %v334_v54  ;;  %v382_v6 = vadd.f32 0.014752088, %v381_v41  ;;  %v345_v55 = vmul.f32 %v344_v62, %v2033_v44 }
  0xd6   :  { %v2080_v3 = vor.u32 1.1754944e-38, %v320_v53  ;;  %v374_v7 = vmul.f32 %v373_v63, %v2037_v48  ;;  %v1477_v8 = vor.u32 %v1685_v43, %v1476_v42  ;;  %v1509_v9 = vor.u32 %v1693_v46, %v1508_v45  ;;  %v1404_v20 = vld [vmem:[#allocation9 + $0x60] sm:$0xf]  ;;  %v1667_v27 = vld [vmem:[#allocation9 + $0x6c] sm:$0xf0] }
  0xd7   :  { %v383_v14 = vmul.f32 %v382_v6, %v2037_v48  ;;  %v1409_v15 = vor.u32 %v1668_v51, %v1408_v50  ;;  %v1441_v16 = vor.u32 %v1676_v60, %v1440_v56  ;;  %vm274_vm0 = vweird.f32 %v2057_v34  ;;  %v1436_v33 = vld [vmem:[#allocation9 + $0x160] sm:$0xf]  ;;  %v1675_v35 = vld [vmem:[#allocation9 + $0x16c] sm:$0xf0]  ;;  %v1468_v41 = vld [vmem:[#allocation9 + $0x64] sm:$0xf] }
  0xd8   :  { %vm2092_vm1 = vcmp.eq.f32.partialorder %v278_v47, 8.507059e+37  ;;  %v346_v24 = vadd.f32 0.4994258, %v345_v55  ;;  %v375_v26 = vadd.f32 0.18741608, %v374_v7  ;;  %791 = vmatpush.bf16.msrb.mxu0 %v1477_v8  ;;  %805 = vmatpush.bf16.msrb.mxu1 %v1509_v9  ;;  %vm314_vm2 = vweird.f32 %v2059_v36 }
  0xd9   :  { %v2084_v13 = vpop.eup %1747  ;;  %vm2099_vm3 = vcmp.eq.f32.partialorder %v318_v61, 8.507059e+37  ;;  %v336_v31 = vmul.f32 %v335_v4, %v2033_v44  ;;  %v384_v32 = vadd.f32 0.112945676, %v383_v14  ;;  %567 = vmatpush.bf16.msra.mxu2 %v1409_v15  ;;  %581 = vmatpush.bf16.msra.mxu3 %v1441_v16  ;;  %v1473_v39 = vor.u32 %v1684_v11, %v1472_v10  ;;  %v1683_v42 = vld [vmem:[#allocation9 + $0x70] sm:$0xf0] }
  0xda   :  { %v2087_v21 = vpop.eup %1749  ;;  %v270_v22 = vmul.f32 %v2084_v13, %v2057_v34  ;;  %v347_v38 = vmul.f32 %v346_v24, %v2033_v44  ;;  %v376_v1 = vmul.f32 %v375_v26, %v2037_v48  ;;  %vm275_vm4 = vweird.f32 %v2084_v13  ;;  %v1500_v50 = vld [vmem:[#allocation9 + $0x164] sm:$0xf]  ;;  %v1691_v51 = vld [vmem:[#allocation9 + $0x170] sm:$0xf0]  ;;  %v1400_v61 = vld [vmem:[#allocation9 + $0x40] sm:$0xf] }
  0xdb   :  { %v310_v29 = vmul.f32 %v2087_v21, %v2059_v36  ;;  %v385_v45 = vmul.f32 %v384_v32, %v2037_v48  ;;  %v1505_v46 = vor.u32 %v1692_v19, %v1504_v17  ;;  %vm315_vm5 = vweird.f32 %v2087_v21  ;;  %v1666_v62 = vld [vmem:[#allocation9 + $0x4c] sm:$0xf0]  ;;  %vm2118_vm6 = vmor %vm274_vm0, %vm275_vm4  ;;  %v1432_v55 = vld [vmem:[#allocation9 + $0x140] sm:$0xf] }
  0xdc   :  { %v271_v37 = vsub.f32 1.0, %v270_v22  ;;  %v2110_v49 = vadd.f32 1.0, %v347_v38  ;;  %792 = vmatpush.bf16.msrb.mxu0 %v1473_v39  ;;  %v1405_v44 = vor.u32 %v1667_v27, %v1404_v20  ;;  %v1437_v56 = vor.u32 %v1675_v35, %v1436_v33  ;;  %vm2134_vm7 = vmor %vm314_vm2, %vm315_vm5  ;;  %v1674_v11 = vld [vmem:[#allocation9 + $0x14c] sm:$0xf0]  ;;  %v1464_v14 = vld [vmem:[#allocation9 + $0x44] sm:$0xf] }
  0xdd   :  { %v311_v43 = vsub.f32 1.0, %v310_v29  ;;  %v386_v54 = vadd.f32 0.4994258, %v385_v45  ;;  %806 = vmatpush.bf16.msrb.mxu1 %v1505_v46  ;;  %v1469_v60 = vor.u32 %v1683_v42, %v1468_v41  ;;  %v2122_v4 = vadd.f32 1.1283791, %v336_v31 }
  0xde   :  { %v272_v47 = vmul.f32 %v2084_v13, %v271_v37  ;;  %1751 = vrcp.f32 %v2110_v49  ;;  %v2125_v6 = vadd.f32 1.1283791, %v376_v1  ;;  %568 = vmatpush.bf16.msra.mxu2 %v1405_v44  ;;  %v258_v7 = vmul.f32 %v2063_v40, %v1998_v58  ;;  %582 = vmatpush.bf16.msra.mxu3 %v1437_v56  ;;  %v1682_v16 = vld [vmem:[#allocation9 + $0x50] sm:$0xf0]  ;;  %v1496_v17 = vld [vmem:[#allocation9 + $0x144] sm:$0xf] }
  0xdf   :  { %v312_v53 = vmul.f32 %v2087_v21, %v311_v43  ;;  %v358_v9 = vand.u32 2147483647, %v2110_v49  ;;  %v387_v10 = vmul.f32 %v386_v54, %v2037_v48  ;;  %v298_v40 = vmul.f32 %v2066_v5, %v2001_v59  ;;  %v1690_v19 = vld [vmem:[#allocation9 + $0x150] sm:$0xf0]  ;;  %v1396_v24 = vld [vmem:[#allocation9 + $0x20] sm:$0xf] }
  0xe0   :  { %v273_v63 = vadd.f32 %v2084_v13, %v272_v47  ;;  %793 = vmatpush.bf16.msrb.mxu0 %v1469_v60  ;;  %v1501_v36 = vor.u32 %v1691_v51, %v1500_v50  ;;  %v1401_v15 = vor.u32 %v1666_v62, %v1400_v61  ;;  %v360_v22 = vand.u32 2147483648, %v2110_v49  ;;  %v1665_v59 = vld [vmem:[#allocation9 + $0x2c] sm:$0xf0]  ;;  %v1428_v5 = vld [vmem:[#allocation9 + $0x120] sm:$0xf] }
  0xe1   :  { %v313_v8 = vadd.f32 %v2087_v21, %v312_v53  ;;  %v1673_v26 = vld [vmem:[#allocation9 + $0x12c] sm:$0xf0]  ;;  %v1460_v23 = vld [vmem:[#allocation9 + $0x24] sm:$0xf]  ;;  %v1681_v31 = vld [vmem:[#allocation9 + $0x30] sm:$0xf0]  ;;  %v1465_v39 = vor.u32 %v1682_v16, %v1464_v14  ;;  %v1497_v41 = vor.u32 %v1690_v19, %v1496_v17  ;;  %vm354_vm10 = vweird.f32 %v2110_v49 }
  0xe2   :  { %v277_v58 = vsel %vm2118_vm6, %v2084_v13, %v273_v63  ;;  %v2152_v13 = vadd.f32 1.0, %v387_v10  ;;  %807 = vmatpush.bf16.msrb.mxu1 %v1501_v36  ;;  %569 = vmatpush.bf16.msra.mxu2 %v1401_v15  ;;  %v1492_v32 = vld [vmem:[#allocation9 + $0x124] sm:$0xf]  ;;  %v2159_v37 = vld [vmem:[#allocation9] sm:$0xf]  ;;  %vm2168_vm8 = vcmp.eq.f32.partialorder %v358_v9, 8.507059e+37  ;;  %v1429_v54 = vor.u32 %v1673_v26, %v1428_v5 }
  0xe3   :  { %v282_v48 = vsel %vm2092_vm1, %v2078_v2, %v277_v58  ;;  %v317_v20 = vsel %vm2134_vm7, %v2087_v21, %v313_v8  ;;  %v1433_v2 = vor.u32 %v1674_v11, %v1432_v55  ;;  %v1689_v21 = vld [vmem:[#allocation9 + $0x130] sm:$0xf0]  ;;  %v2161_v38 = vld [vmem:[#allocation9 + $0xc] sm:$0xf0]  ;;  %v1424_v42 = vld [vmem:[#allocation9 + $0x100] sm:$0xf]  ;;  %v1461_v63 = vor.u32 %v1681_v31, %v1460_v23 }
  0xe4   :  { %v283_v27 = vmul.f32 %v282_v48, %v258_v7  ;;  %v322_v29 = vsel %vm2099_vm3, %v2080_v3, %v317_v20  ;;  %1753 = vrcp.f32 %v2152_v13  ;;  %v398_v35 = vand.u32 2147483647, %v2152_v13  ;;  %v2163_v1 = vpop.eup %1751  ;;  %v1672_v43 = vld [vmem:[#allocation9 + $0x10c] sm:$0xf0]  ;;  %v2172_v44 = vld [vmem:[#allocation9 + $0x4] sm:$0xf]  ;;  %794 = vmatpush.bf16.msrb.mxu0 %v1465_v39 }
  0xe5   :  { %v323_v33 = vmul.f32 %v322_v29, %v298_v40  ;;  %v239_v3 = vmul.f32 0.5, %v1995_v57  ;;  %583 = vmatpush.bf16.msra.mxu3 %v1433_v2  ;;  %v350_v46 = vmul.f32 %v2163_v1, %v2110_v49  ;;  %v2174_v50 = vld [vmem:[#allocation9 + $0x10] sm:$0xf0]  ;;  %v361_v53 = vor.u32 1.1754944e-38, %v360_v22  ;;  %v1488_v56 = vld [vmem:[#allocation9 + $0x104] sm:$0xf] }
  0xe6   :  { %v1378_v30 = vclamps-f32 %v283_v27, 1.0  ;;  %808 = vmatpush.bf16.msrb.mxu1 %v1497_v41  ;;  %v1397_v57 = vor.u32 %v1665_v59, %v1396_v24  ;;  %v1688_v60 = vld [vmem:[#allocation9 + $0x110] sm:$0xf0]  ;;  %v1493_v0 = vor.u32 %v1689_v21, %v1492_v32  ;;  %v1548_v55 = vld [vmem:[#allocation9 + $0xe8] sm:$0xf]  ;;  %vm355_vm9 = vweird.f32 %v2163_v1 }
  0xe7   :  { %v1379_v45 = vclamps-f32 %v323_v33, 1.0  ;;  %v351_v62 = vsub.f32 1.0, %v350_v46  ;;  %v1703_v7 = vld [vmem:[#allocation9 + $0xf4] sm:$0xf0]  ;;  %v1393_v34 = vor.u32 %v2161_v38, %v2159_v37  ;;  %v1425_v9 = vor.u32 %v1672_v43, %v1424_v42  ;;  %v1580_v10 = vld [vmem:[#allocation9 + $0x1e8] sm:$0xf]  ;;  %vm2195_vm11 = vmor %vm354_vm10, %vm355_vm9 }
  0xe8   :  { %v406_v51 = vadd.f32 1.0, %v1378_v30  ;;  %570 = vmatpush.bf16.msra.mxu2 %v1397_v57  ;;  %v1711_v11 = vld [vmem:[#allocation9 + $0x1f4] sm:$0xf0]  ;;  %v1612_v14 = vld [vmem:[#allocation9 + $0xec] sm:$0xf]  ;;  %v1457_v15 = vor.u32 %v2174_v50, %v2172_v44  ;;  %795 = vmatpush.bf16.msrb.mxu0 %v1461_v63  ;;  %v1549_v20 = vor.u32 %v1703_v7, %v1548_v55  ;;  %v338_v32 = vmul.f32 %v2122_v4, %v2020_v25 }
  0xe9   :  { %v407_v61 = vadd.f32 1.0, %v1379_v45  ;;  %584 = vmatpush.bf16.msra.mxu3 %v1429_v54  ;;  %v352_v36 = vmul.f32 %v2163_v1, %v351_v62  ;;  %v1719_v16 = vld [vmem:[#allocation9 + $0xf8] sm:$0xf0]  ;;  %v1644_v17 = vld [vmem:[#allocation9 + $0x1ec] sm:$0xf]  ;;  %v1581_v22 = vor.u32 %v1711_v11, %v1580_v10  ;;  %v400_v37 = vand.u32 2147483648, %v2152_v13 }
  0xea   :  { %v410_v8 = vmul.f32 %v406_v51, %v2073_v52  ;;  %v2180_v58 = vpop.eup %1753  ;;  %v1489_v52 = vor.u32 %v1688_v60, %v1488_v56  ;;  %v1727_v19 = vld [vmem:[#allocation9 + $0x1f8] sm:$0xf0]  ;;  %809 = vmatpush.bf16.msrb.mxu1 %v1493_v0  ;;  %v1544_v24 = vld [vmem:[#allocation9 + $0xc8] sm:$0xf]  ;;  %v1702_v59 = vld [vmem:[#allocation9 + $0xd4] sm:$0xf0]  ;;  %v1613_v29 = vor.u32 %v1719_v16, %v1612_v14  ;;  %vm394_vm14 = vweird.f32 %v2152_v13 }
  0xeb   :  { %v411_v40 = vmul.f32 %v407_v61, %v239_v3  ;;  %v390_v48 = vmul.f32 %v2180_v58, %v2152_v13  ;;  %v1576_v5 = vld [vmem:[#allocation9 + $0x1c8] sm:$0xf]  ;;  %v353_v27 = vadd.f32 %v2163_v1, %v352_v36  ;;  %v1645_v2 = vor.u32 %v1727_v19, %v1644_v17  ;;  %v1710_v23 = vld [vmem:[#allocation9 + $0x1d4] sm:$0xf0]  ;;  %v1608_v31 = vld [vmem:[#allocation9 + $0xcc] sm:$0xf] }
  0xec   :  { %571 = vmatpush.bf16.msra.mxu2 %v1393_v34  ;;  %v1718_v38 = vld [vmem:[#allocation9 + $0xd8] sm:$0xf0]  ;;  %v1640_v30 = vld [vmem:[#allocation9 + $0x1cc] sm:$0xf]  ;;  %v1545_v4 = vor.u32 %v1702_v59, %v1544_v24  ;;  %v1577_v49 = vor.u32 %v1710_v23, %v1576_v5  ;;  %v1540_v39 = vld [vmem:[#allocation9 + $0xa8] sm:$0xf]  ;;  %vm395_vm12 = vweird.f32 %v2180_v58  ;;  %796 = vmatpush.bf16.msrb.mxu0 %v1457_v15  ;;  %v378_v0 = vmul.f32 %v2125_v6, %v2025_v28 }
  0xed   :  { %v414_v26 = vpack.c.bf16 %v411_v40, %v410_v8  ;;  %v391_v33 = vsub.f32 1.0, %v390_v48  ;;  %585 = vmatpush.bf16.msra.mxu3 %v1425_v9  ;;  %v357_v25 = vsel %vm2195_vm11, %v2163_v1, %v353_v27  ;;  %v1726_v3 = vld [vmem:[#allocation9 + $0x1d8] sm:$0xf0]  ;;  %v1701_v43 = vld [vmem:[#allocation9 + $0xb4] sm:$0xf0]  ;;  %vm2209_vm13 = vcmp.eq.f32.partialorder %v398_v35, 8.507059e+37  ;;  %vm396_vm15 = vmor %vm394_vm14, %vm395_vm12 }
  0xee   :  { %v362_v41 = vsel %vm2168_vm8, %v361_v53, %v357_v25  ;;  %810 = vmatpush.bf16.msrb.mxu1 %v1489_v52  ;;  %v1572_v45 = vld [vmem:[#allocation9 + $0x1a8] sm:$0xf]  ;;  %v1709_v46 = vld [vmem:[#allocation9 + $0x1b4] sm:$0xf0]  ;;  %v1609_v47 = vor.u32 %v1718_v38, %v1608_v31  ;;  %v1641_v50 = vor.u32 %v1726_v3, %v1640_v30  ;;  %v1604_v51 = vld [vmem:[#allocation9 + $0xac] sm:$0xf]  ;;  %v1541_v61 = vor.u32 %v1701_v43, %v1540_v39 }
  0xef   :  { %416 = vst [vmem:[#allocation2] sm:$0xff] %v414_v26  ;;  %v392_v42 = vmul.f32 %v2180_v58, %v391_v33  ;;  %v363_v44 = vmul.f32 %v362_v41, %v338_v32  ;;  %v1717_v57 = vld [vmem:[#allocation9 + $0xb8] sm:$0xf0]  ;;  %v1636_v54 = vld [vmem:[#allocation9 + $0x1ac] sm:$0xf]  ;;  %v401_v35 = vor.u32 1.1754944e-38, %v400_v37  ;;  %v1573_v62 = vor.u32 %v1709_v46, %v1572_v45 }
  0xf0   :  { %1001 = vmatpush.bf16.msrb.mxu2 %v1549_v20  ;;  %1213 = vmatpush.bf16.msra.mxu0 %v1613_v29  ;;  %v1725_v56 = vld [vmem:[#allocation9 + $0x1b8] sm:$0xf0]  ;;  %v1536_v63 = vld [vmem:[#allocation9 + $0x88] sm:$0xf]  ;;  %v1700_v7 = vld [vmem:[#allocation9 + $0x94] sm:$0xf0]  ;;  %v1605_v9 = vor.u32 %v1717_v57, %v1604_v51 }
  0xf1   :  { %1015 = vmatpush.bf16.msrb.mxu3 %v1581_v22  ;;  %v393_v53 = vadd.f32 %v2180_v58, %v392_v42  ;;  %v1380_v60 = vclamps-f32 %v363_v44, 1.0  ;;  %v1568_v13 = vld [vmem:[#allocation9 + $0x188] sm:$0xf]  ;;  %v1708_v8 = vld [vmem:[#allocation9 + $0x194] sm:$0xf0]  ;;  %v1637_v10 = vor.u32 %v1725_v56, %v1636_v54  ;;  %v1537_v28 = vor.u32 %v1700_v7, %v1536_v63 }
  0xf2   :  { %1227 = vmatpush.bf16.msra.mxu1 %v1645_v2  ;;  %v1600_v11 = vld [vmem:[#allocation9 + $0x8c] sm:$0xf]  ;;  %v1716_v14 = vld [vmem:[#allocation9 + $0x98] sm:$0xf0]  ;;  %v1569_v6 = vor.u32 %v1708_v8, %v1568_v13  ;;  %v1699_v16 = vld [vmem:[#allocation9 + $0x74] sm:$0xf0] }
  0xf3   :  { %v397_v55 = vsel %vm396_vm15, %v2180_v58, %v393_v53  ;;  %v408_v40 = vadd.f32 1.0, %v1380_v60  ;;  %v1632_v15 = vld [vmem:[#allocation9 + $0x18c] sm:$0xf]  ;;  %v1724_v52 = vld [vmem:[#allocation9 + $0x198] sm:$0xf0]  ;;  %v240_v17 = vmul.f32 0.5, %v2013_v12  ;;  %v1601_v22 = vor.u32 %v1716_v14, %v1600_v11 }
  0xf4   :  { %1002 = vmatpush.bf16.msrb.mxu2 %v1545_v4  ;;  %v402_v34 = vsel %vm2209_vm13, %v401_v35, %v397_v55  ;;  %1214 = vmatpush.bf16.msra.mxu0 %v1609_v47  ;;  %v1532_v58 = vld [vmem:[#allocation9 + $0x68] sm:$0xf]  ;;  %v1707_v20 = vld [vmem:[#allocation9 + $0x174] sm:$0xf0]  ;;  %v1633_v24 = vor.u32 %v1724_v52, %v1632_v15  ;;  %v1596_v59 = vld [vmem:[#allocation9 + $0x6c] sm:$0xf] }
  0xf5   :  { %1016 = vmatpush.bf16.msrb.mxu3 %v1577_v49  ;;  %v403_v36 = vmul.f32 %v402_v34, %v378_v0  ;;  %v1564_v48 = vld [vmem:[#allocation9 + $0x168] sm:$0xf]  ;;  %v1715_v5 = vld [vmem:[#allocation9 + $0x78] sm:$0xf0]  ;;  %v412_v26 = vmul.f32 %v408_v40, %v240_v17  ;;  %v241_v27 = vmul.f32 0.5, %v2017_v18  ;;  %v1533_v31 = vor.u32 %v1699_v16, %v1532_v58 }
  0xf6   :  { %1228 = vmatpush.bf16.msra.mxu1 %v1641_v50  ;;  %v1628_v2 = vld [vmem:[#allocation9 + $0x16c] sm:$0xf]  ;;  %v1723_v23 = vld [vmem:[#allocation9 + $0x178] sm:$0xf0]  ;;  %v1565_v32 = vor.u32 %v1707_v20, %v1564_v48  ;;  %v1528_v12 = vld [vmem:[#allocation9 + $0x48] sm:$0xf]  ;;  %v1597_v30 = vor.u32 %v1715_v5, %v1596_v59 }
  0xf7   :  { %v1381_v19 = vclamps-f32 %v403_v36, 1.0  ;;  %v1698_v33 = vld [vmem:[#allocation9 + $0x54] sm:$0xf0]  ;;  %v1560_v37 = vld [vmem:[#allocation9 + $0x148] sm:$0xf]  ;;  %v1629_v25 = vor.u32 %v1723_v23, %v1628_v2 }
  0xf8   :  { %1003 = vmatpush.bf16.msrb.mxu2 %v1541_v61  ;;  %1215 = vmatpush.bf16.msra.mxu0 %v1605_v9  ;;  %v1706_v38 = vld [vmem:[#allocation9 + $0x154] sm:$0xf0]  ;;  %v1592_v4 = vld [vmem:[#allocation9 + $0x4c] sm:$0xf]  ;;  %v1714_v3 = vld [vmem:[#allocation9 + $0x58] sm:$0xf0]  ;;  %v1529_v41 = vor.u32 %v1698_v33, %v1528_v12 }
  0xf9   :  { %1017 = vmatpush.bf16.msrb.mxu3 %v1573_v62  ;;  %v409_v29 = vadd.f32 1.0, %v1381_v19  ;;  %v1624_v18 = vld [vmem:[#allocation9 + $0x14c] sm:$0xf]  ;;  %v1722_v39 = vld [vmem:[#allocation9 + $0x158] sm:$0xf0]  ;;  %v1561_v42 = vor.u32 %v1706_v38, %v1560_v37  ;;  %v1593_v1 = vor.u32 %v1714_v3, %v1592_v4 }
  0xfa   :  { %1229 = vmatpush.bf16.msra.mxu1 %v1637_v10  ;;  %v1524_v43 = vld [vmem:[#allocation9 + $0x28] sm:$0xf]  ;;  %v1697_v45 = vld [vmem:[#allocation9 + $0x34] sm:$0xf0]  ;;  %v1625_v47 = vor.u32 %v1722_v39, %v1624_v18  ;;  %v1588_v50 = vld [vmem:[#allocation9 + $0x2c] sm:$0xf] }
  0xfb   :  { %v413_v21 = vmul.f32 %v409_v29, %v241_v27  ;;  %v1556_v46 = vld [vmem:[#allocation9 + $0x128] sm:$0xf]  ;;  %v1705_v44 = vld [vmem:[#allocation9 + $0x134] sm:$0xf0]  ;;  %v1713_v51 = vld [vmem:[#allocation9 + $0x38] sm:$0xf0]  ;;  %v1525_v54 = vor.u32 %v1697_v45, %v1524_v43 }
  0xfc   :  { %1004 = vmatpush.bf16.msrb.mxu2 %v1537_v28  ;;  %1216 = vmatpush.bf16.msra.mxu0 %v1601_v22  ;;  %v1620_v53 = vld [vmem:[#allocation9 + $0x12c] sm:$0xf]  ;;  %v1721_v57 = vld [vmem:[#allocation9 + $0x138] sm:$0xf0]  ;;  %v1557_v56 = vor.u32 %v1705_v44, %v1556_v46  ;;  %v1520_v60 = vld [vmem:[#allocation9 + $0x8] sm:$0xf]  ;;  %v1589_v62 = vor.u32 %v1713_v51, %v1588_v50 }
  0xfd   :  { %1018 = vmatpush.bf16.msrb.mxu3 %v1569_v6  ;;  %v415_v49 = vpack.c.bf16 %v413_v21, %v412_v26  ;;  %v1696_v35 = vld [vmem:[#allocation9 + $0x14] sm:$0xf0]  ;;  %v1384_v61 = vld [vmem:[#allocation2] sm:$0xf]  ;;  %v1621_v63 = vor.u32 %v1721_v57, %v1620_v53  ;;  %v1552_v0 = vld [vmem:[#allocation9 + $0x108] sm:$0xf] }
  0xfe   :  { %1230 = vmatpush.bf16.msra.mxu1 %v1633_v24  ;;  %v1704_v55 = vld [vmem:[#allocation9 + $0x114] sm:$0xf0]  ;;  %v1584_v7 = vld [vmem:[#allocation9 + $0xc] sm:$0xf]  ;;  %v1712_v13 = vld [vmem:[#allocation9 + $0x18] sm:$0xf0]  ;;  %v1521_v36 = vor.u32 %v1696_v35, %v1520_v60 }
  0xff   :  { %417 = vst [vmem:[#allocation2 + $0x8] sm:$0xff] %v415_v49  ;;  %v1616_v8 = vld [vmem:[#allocation9 + $0x10c] sm:$0xf]  ;;  %v1720_v34 = vld [vmem:[#allocation9 + $0x118] sm:$0xf0]  ;;  %v1553_v15 = vor.u32 %v1704_v55, %v1552_v0  ;;  %v1585_v52 = vor.u32 %v1712_v13, %v1584_v7  ;;  %v1934_v60 = vmov 128.0  }
 0x100   :  { %1005 = vmatpush.bf16.msrb.mxu2 %v1533_v31  ;;  %1217 = vmatpush.bf16.msra.mxu0 %v1597_v30  ;;  %v1662_v10 = vld [vmem:[#allocation2 + $0x4] sm:$0xf]  ;;  %v1617_v28 = vor.u32 %v1720_v34, %v1616_v8  ;;  %v1741_v6 = vld [vmem:[#allocation11 + $0x1] ss:$0 sm:$0xff]  ;;  %v1742_v19 = vld [vmem:[#allocation11] ss:$0 sm:$0xff]  ;;  %1755 = vrcp.f32 %v1934_v60 }
 0x101   :  { %1019 = vmatpush.bf16.msrb.mxu3 %v1565_v32  ;;  %v1743_v33 = vld [vmem:[#allocation11 + $0x3] ss:$0 sm:$0xff] }
 0x102   :  { %1231 = vmatpush.bf16.msra.mxu1 %v1629_v25  ;;  %v1744_v25 = vld [vmem:[#allocation11 + $0x2] ss:$0 sm:$0xff] }
 0x104   :  { %1006 = vmatpush.bf16.msrb.mxu2 %v1529_v41  ;;  %1218 = vmatpush.bf16.msra.mxu0 %v1593_v1 }
 0x105   :  { %1020 = vmatpush.bf16.msrb.mxu3 %v1561_v42 }
 0x106   :  { %1232 = vmatpush.bf16.msra.mxu1 %v1625_v47  ;;  %v1663_v9 = vld [vmem:[#allocation2 + $0x4] sm:$0xf0]  ;;  %v1386_v11 = vld [vmem:[#allocation2 + $0x8] sm:$0xf0]  ;;  %v1756_v35 = vpop.eup %1755 }
 0x107   :  { %v1385_v14 = vor.u32 %v1663_v9, %v1384_v61  ;;  %v1389_v40 = vor.u32 %v1662_v10, %v1386_v11  ;;  %v597_v61 = vmul.f32 128.0, %v1756_v35  ;;  %vm601_vm0 = vweird.f32 %v1756_v35 }
 0x108   :  { %1007 = vmatpush.bf16.msrb.mxu2 %v1525_v54  ;;  %1219 = vmatpush.bf16.msra.mxu0 %v1589_v62 }
 0x109   :  { %1021 = vmatpush.bf16.msrb.mxu3 %v1557_v56  ;;  %572 = vmatmul.bf16.vlgmr.msra.gmra.mxu2 %v1385_v14  ;;  %v598_v62 = vsub.f32 1.0, %v597_v61 }
 0x10a   :  { %1233 = vmatpush.bf16.msra.mxu1 %v1621_v63  ;;  %586 = vmatmul.bf16.vlgmr.msra.gmra.mxu3 %v1389_v40 }
 0x10b   :  { %797 = vmatmul.bf16.vlgmr.msrb.gmra.mxu0 %v1385_v14  ;;  %811 = vmatmul.bf16.vlgmr.msrb.gmra.mxu1 %v1389_v40  ;;  %v599_v63 = vmul.f32 %v1756_v35, %v598_v62 }
 0x10c   :  { %1008 = vmatpush.bf16.msrb.mxu2 %v1521_v36  ;;  %1220 = vmatpush.bf16.msra.mxu0 %v1585_v52 }
 0x10d   :  { %1022 = vmatpush.bf16.msrb.mxu3 %v1553_v15  ;;  %v600_v0 = vadd.f32 %v1756_v35, %v599_v63 }
 0x10e   :  { %1234 = vmatpush.bf16.msra.mxu1 %v1617_v28 }
 0x10f   :  { %v2264_v7 = vsel %vm601_vm0, %v1756_v35, %v600_v0 }
 0x119   :  { %1009 = vmatmul.bf16.vlgmr.msrb.gmra.mxu2 %v1385_v14 }
 0x11a   :  { %1023 = vmatmul.bf16.vlgmr.msrb.gmra.mxu3 %v1389_v40 }
 0x11b   :  { %1221 = vmatmul.bf16.vlgmr.msra.gmra.mxu0 %v1385_v14  ;;  %1235 = vmatmul.bf16.vlgmr.msra.gmra.mxu1 %v1389_v40 }
 0x188   :  { %v798_v58 = vpop.f32.mrf.mxu0  ;;  %v812_v16 = vpop.f32.mrf.mxu1 }
 0x189   :  { %v799_v17 = vadd.f32 %v1741_v6, %v798_v58 }
 0x18b   :  { %v2224_v48 = vadd.f32 %v812_v16, %v799_v17 }
 0x18c   :  { %v573_v20 = vpop.f32.mrf.mxu2 }
 0x18d   :  { %817 = vadd.xlane.f32.xlu1 %v2224_v48  ;;  %v587_v22 = vpop.f32.mrf.mxu3  ;;  %v574_v24 = vadd.f32 %v1742_v19, %v573_v20  ;;  %v823_v2 = vmul.f32 %v2224_v48, %v2224_v48 }
 0x18f   :  { %v2227_v59 = vadd.f32 %v587_v22, %v574_v24 }
 0x190   :  { %v800_v5 = vpop.f32.mrf.mxu0  ;;  %v814_v26 = vpop.f32.mrf.mxu1 }
 0x191   :  { %v801_v27 = vadd.f32 %v1741_v6, %v800_v5  ;;  %592 = vadd.xlane.f32.xlu0 %v2227_v59  ;;  %v605_v29 = vmul.f32 %v2227_v59, %v2227_v59 }
 0x193   :  { %607 = vadd.xlane.f32.xlu2 %v605_v29  ;;  %v2234_v32 = vadd.f32 %v814_v26, %v801_v27 }
 0x194   :  { %v575_v23 = vpop.f32.mrf.mxu2 }
 0x195   :  { %825 = vadd.xlane.f32.xlu1 %v823_v2  ;;  %v589_v31 = vpop.f32.mrf.mxu3  ;;  %v576_v12 = vadd.f32 %v1742_v19, %v575_v23  ;;  %v824_v30 = vmul.f32 %v2234_v32, %v2234_v32 }
 0x197   :  { %v2236_v21 = vadd.f32 %v589_v31, %v576_v12 }
 0x198   :  { %v1222_v37 = vpop.f32.mrf.mxu0  ;;  %v1236_v38 = vpop.f32.mrf.mxu1 }
 0x199   :  { %594 = vadd.xlane.f32.xlu0 %v2236_v21  ;;  %v1223_v4 = vadd.f32 %v1743_v33, %v1222_v37  ;;  %v606_v51 = vmul.f32 %v2236_v21, %v2236_v21 }
 0x19b   :  { %827 = vadd.xlane.f32.xlu2 %v824_v30  ;;  %v2242_v39 = vadd.f32 %v1236_v38, %v1223_v4 }
 0x19c   :  { %v1010_v49 = vpop.f32.mrf.mxu2 }
 0x19d   :  { %819 = vadd.xlane.f32.xlu1 %v2234_v32  ;;  %v1024_v3 = vpop.f32.mrf.mxu3  ;;  %v1011_v18 = vadd.f32 %v1744_v25, %v1010_v49  ;;  %v1247_v54 = vmul.f32 %v2242_v39, %v2242_v39  ;;  %v2291_v49 = vld [vmem:[%s2367_s5] ss:$0 sm:$0xff] }
 0x19f   :  { %v2244_v43 = vadd.f32 %v1024_v3, %v1011_v18 }
 0x1a0   :  { %v1224_v41 = vpop.f32.mrf.mxu0  ;;  %v1238_v45 = vpop.f32.mrf.mxu1 }
 0x1a1   :  { %v1225_v42 = vadd.f32 %v1743_v33, %v1224_v41  ;;  %1241 = vadd.xlane.f32.xlu0 %v2242_v39  ;;  %v1035_v57 = vmul.f32 %v2244_v43, %v2244_v43 }
 0x1a3   :  { %v2247_v46 = vadd.f32 %v1238_v45, %v1225_v42  ;;  %1029 = vadd.xlane.f32.xlu2 %v2244_v43 }
 0x1a4   :  { %v1012_v44 = vpop.f32.mrf.mxu2 }
 0x1a5   :  { %1243 = vadd.xlane.f32.xlu1 %v2247_v46  ;;  %v1013_v1 = vadd.f32 %v1744_v25, %v1012_v44  ;;  %v1026_v47 = vpop.f32.mrf.mxu3  ;;  %v1248_v56 = vmul.f32 %v2247_v46, %v2247_v46 }
 0x1a7   :  { %v2251_v50 = vadd.f32 %v1026_v47, %v1013_v1 }
 0x1a9   :  { %609 = vadd.xlane.f32.xlu0 %v606_v51  ;;  %v1036_v53 = vmul.f32 %v2251_v50, %v2251_v50 }
 0x1ab   :  { %1031 = vadd.xlane.f32.xlu2 %v2251_v50 }
 0x1ad   :  { %1039 = vadd.xlane.f32.xlu1 %v1036_v53  ;;  %v2299_v53 = vld [vmem:[%s2368_s6] ss:$0 sm:$0xff]  ;;  %s1935_s6 = smov [#allocation12]  }
 0x1ae   :  { %s1297_s28 = sshll.u32 %s1935_s6, 4  ;;  %s1298_s28 = int_to_ptr.vmem [resolvable:$true] %s1297_s28 }
 0x1b1   :  { %1037 = vadd.xlane.f32.xlu0 %v1035_v57 }
 0x1b3   :  { %1249 = vadd.xlane.f32.xlu2 %v1247_v54 }
 0x1b9   :  { %1251 = vadd.xlane.f32.xlu0 %v1248_v56 }
 0x200   :  { %v818_v55 = vpop.xlane.xlu1 %817 }
 0x201   :  { %v2267_v13 = vmul.f32 %v818_v55, %v2264_v7 }
 0x203   :  { %v831_v40 = vmul.f32 %v2267_v13, %v2267_v13 }
 0x204   :  { %v593_v8 = vpop.xlane.xlu0 %592 }
 0x205   :  { %v603_v34 = vmul.f32 %v2264_v7, %v593_v8 }
 0x206   :  { %v608_v9 = vpop.xlane.xlu2 %607 }
 0x207   :  { %v613_v10 = vmul.f32 %v603_v34, %v603_v34  ;;  %v611_v14 = vmul.f32 %v608_v9, %v2264_v7 }
 0x208   :  { %v826_v11 = vpop.xlane.xlu1 %825 }
 0x209   :  { %v829_v36 = vmul.f32 %v826_v11, %v2264_v7  ;;  %v615_v15 = vsub.f32 %v611_v14, %v613_v10 }
 0x20b   :  { %v833_v52 = vsub.f32 %v829_v36, %v831_v40  ;;  %v617_v28 = vadd.f32 1e-05, %v615_v15 }
 0x20c   :  { %v595_v58 = vpop.xlane.xlu0 %594 }
 0x20d   :  { %v835_v6 = vadd.f32 1e-05, %v833_v52  ;;  %1757 = vrsqrt.f32 %v617_v28  ;;  %v2286_v4 = vmul.f32 %v2264_v7, %v595_v58  ;;  %vm625_vm3 = vweird.f32 %v617_v28 }
 0x20e   :  { %v828_v16 = vpop.xlane.xlu2 %827 }
 0x20f   :  { %1759 = vrsqrt.f32 %v835_v6  ;;  %v830_v22 = vmul.f32 %v828_v16, %v2264_v7  ;;  %vm843_vm4 = vweird.f32 %v835_v6  ;;  %v614_v47 = vmul.f32 %v2286_v4, %v2286_v4 }
 0x210   :  { %v820_v17 = vpop.xlane.xlu1 %819 }
 0x211   :  { %v2275_v19 = vmul.f32 %v820_v17, %v2264_v7 }
 0x213   :  { %v832_v20 = vmul.f32 %v2275_v19, %v2275_v19  ;;  %v1758_v24 = vpop.eup %1757 }
 0x214   :  { %v620_v26 = vmul.f32 %v1758_v24, %v617_v28  ;;  %v1242_v29 = vpop.xlane.xlu0 %1241  ;;  %vm626_vm1 = vweird.f32 %v1758_v24 }
 0x215   :  { %v1760_v5 = vpop.eup %1759  ;;  %v834_v27 = vsub.f32 %v830_v22, %v832_v20  ;;  %vm627_vm5 = vmor %vm625_vm3, %vm626_vm1  ;;  %v2311_v8 = vmul.f32 %v1242_v29, %v2264_v7 }
 0x216   :  { %v838_v2 = vmul.f32 %v1760_v5, %v835_v6  ;;  %v621_v23 = vmul.f32 %v1758_v24, %v620_v26  ;;  %v1030_v12 = vpop.xlane.xlu2 %1029  ;;  %vm844_vm2 = vweird.f32 %v1760_v5 }
 0x217   :  { %v2280_v31 = vadd.f32 1e-05, %v834_v27  ;;  %vm845_vm6 = vmor %vm843_vm4, %vm844_vm2  ;;  %v2304_v60 = vmul.f32 %v1030_v12, %v2264_v7 }
 0x218   :  { %v839_v33 = vmul.f32 %v1760_v5, %v838_v2  ;;  %v2282_v37 = vpop.xlane.xlu1 %1243  ;;  %v622_v38 = vmul.f32 0.5, %v621_v23 }
 0x219   :  { %1761 = vrsqrt.f32 %v2280_v31  ;;  %vm853_vm8 = vweird.f32 %v2280_v31  ;;  %v2330_v29 = vmul.f32 %v2282_v37, %v2264_v7 }
 0x21a   :  { %v840_v30 = vmul.f32 0.5, %v839_v33  ;;  %v623_v25 = vsub.f32 1.5, %v622_v38 }
 0x21c   :  { %v841_v3 = vsub.f32 1.5, %v840_v30  ;;  %v624_v18 = vmul.f32 %v1758_v24, %v623_v25  ;;  %v610_v41 = vpop.xlane.xlu0 %609 }
 0x21d   :  { %v612_v45 = vmul.f32 %v610_v41, %v2264_v7 }
 0x21e   :  { %v842_v42 = vmul.f32 %v1760_v5, %v841_v3  ;;  %v628_v1 = vsel %vm627_vm5, %v1758_v24, %v624_v18  ;;  %v1032_v51 = vpop.xlane.xlu2 %1031  ;;  %v1256_v3 = vmul.f32 %v2330_v29, %v2330_v29 }
 0x21f   :  { %v1762_v44 = vpop.eup %1761  ;;  %v642_v54 = vmul.f32 %v2291_v49, %v628_v1  ;;  %v616_v62 = vsub.f32 %v612_v45, %v614_v47  ;;  %v2308_v63 = vmul.f32 %v1032_v51, %v2264_v7 }
 0x220   :  { %v846_v57 = vsel %vm845_vm6, %v1760_v5, %v842_v42  ;;  %v848_v56 = vmul.f32 %v1762_v44, %v2280_v31  ;;  %v1040_v35 = vpop.xlane.xlu1 %1039  ;;  %vm854_vm7 = vweird.f32 %v1762_v44 }
 0x221   :  { %v857_v61 = vmul.f32 %v2291_v49, %v846_v57  ;;  %v646_v0 = vmul.f32 %v642_v54, %v603_v34  ;;  %v618_v10 = vadd.f32 1e-05, %v616_v62  ;;  %v1042_v11 = vmul.f32 %v1040_v35, %v2264_v7  ;;  %vm855_vm9 = vmor %vm853_vm8, %vm854_vm7 }
 0x222   :  { %v849_v55 = vmul.f32 %v1762_v44, %v848_v56  ;;  %v1044_v14 = vmul.f32 %v2308_v63, %v2308_v63  ;;  %v644_v40 = vmul.f32 %v642_v54, %v2227_v59  ;;  %v1043_v34 = vmul.f32 %v2304_v60, %v2304_v60 }
 0x223   :  { %v861_v9 = vmul.f32 %v857_v61, %v2267_v13  ;;  %v651_v36 = vsub.f32 %v2299_v53, %v646_v0  ;;  %v859_v52 = vmul.f32 %v857_v61, %v2224_v48  ;;  %1763 = vrsqrt.f32 %v618_v10 }
 0x224   :  { %v850_v15 = vmul.f32 0.5, %v849_v55  ;;  %v1046_v13 = vsub.f32 %v1042_v11, %v1044_v14  ;;  %v1038_v6 = vpop.xlane.xlu0 %1037  ;;  %v1255_v59 = vmul.f32 %v2311_v8, %v2311_v8  ;;  %vm635_vm11 = vweird.f32 %v618_v10 }
 0x225   :  { %v863_v28 = vsub.f32 %v2299_v53, %v861_v9  ;;  %v653_v58 = vadd.f32 %v651_v36, %v644_v40  ;;  %v1041_v17 = vmul.f32 %v1038_v6, %v2264_v7 }
 0x226   :  { %v851_v16 = vsub.f32 1.5, %v850_v15  ;;  %v1048_v22 = vadd.f32 1e-05, %v1046_v13  ;;  %v1250_v24 = vpop.xlane.xlu2 %1249 }
 0x227   :  { %v865_v20 = vadd.f32 %v863_v28, %v859_v52  ;;  %655 = vst [vmem:[#allocation12] sm:$0xff] %v653_v58  ;;  %v1045_v48 = vsub.f32 %v1041_v17, %v1043_v34  ;;  %v1253_v26 = vmul.f32 %v1250_v24, %v2264_v7 }
 0x228   :  { %v852_v5 = vmul.f32 %v1762_v44, %v851_v16  ;;  %1765 = vrsqrt.f32 %v1048_v22  ;;  %vm1065_vm14 = vweird.f32 %v1048_v22 }
 0x229   :  { %867 = vst [vmem:[#allocation12 + $0x8] sm:$0xff] %v865_v20  ;;  %v1047_v2 = vadd.f32 1e-05, %v1045_v48  ;;  %v1257_v23 = vsub.f32 %v1253_v26, %v1255_v59  ;;  %v1764_v12 = vpop.eup %1763 }
 0x22a   :  { %v856_v27 = vsel %vm855_vm9, %v1762_v44, %v852_v5  ;;  %v630_v38 = vmul.f32 %v1764_v12, %v618_v10  ;;  %vm636_vm10 = vweird.f32 %v1764_v12 }
 0x22b   :  { %v858_v33 = vmul.f32 %v2291_v49, %v856_v27  ;;  %1767 = vrsqrt.f32 %v1047_v2  ;;  %v1259_v30 = vadd.f32 1e-05, %v1257_v23  ;;  %vm637_vm12 = vmor %vm635_vm11, %vm636_vm10  ;;  %vm1055_vm1 = vweird.f32 %v1047_v2 }
 0x22c   :  { %v1252_v25 = vpop.xlane.xlu0 %1251  ;;  %v631_v18 = vmul.f32 %v1764_v12, %v630_v38 }
 0x22d   :  { %v862_v31 = vmul.f32 %v858_v33, %v2275_v19  ;;  %v1254_v41 = vmul.f32 %v1252_v25, %v2264_v7  ;;  %v860_v37 = vmul.f32 %v858_v33, %v2234_v32  ;;  %1769 = vrsqrt.f32 %v1259_v30 }
 0x22e   :  { %v1766_v42 = vpop.eup %1765  ;;  %v632_v44 = vmul.f32 0.5, %v631_v18  ;;  %vm1267_vm4 = vweird.f32 %v1259_v30 }
 0x22f   :  { %v864_v45 = vsub.f32 %v2299_v53, %v862_v31  ;;  %v1060_v1 = vmul.f32 %v1766_v42, %v1048_v22  ;;  %v1258_v47 = vsub.f32 %v1254_v41, %v1256_v3  ;;  %vm1066_vm13 = vweird.f32 %v1766_v42 }
 0x230   :  { %v633_v19 = vsub.f32 1.5, %v632_v44  ;;  %vm1067_vm15 = vmor %vm1065_vm14, %vm1066_vm13 }
 0x231   :  { %v866_v51 = vadd.f32 %v864_v45, %v860_v37  ;;  %v1768_v57 = vpop.eup %1767  ;;  %v1061_v54 = vmul.f32 %v1766_v42, %v1060_v1  ;;  %v1260_v56 = vadd.f32 1e-05, %v1258_v47 }
 0x232   :  { %v1050_v35 = vmul.f32 %v1768_v57, %v1047_v2  ;;  %v634_v61 = vmul.f32 %v1764_v12, %v633_v19  ;;  %vm1056_vm0 = vweird.f32 %v1768_v57 }
 0x233   :  { %868 = vst [vmem:[#allocation12 + $0x28] sm:$0xff] %v866_v51  ;;  %v1062_v7 = vmul.f32 0.5, %v1061_v54  ;;  %1771 = vrsqrt.f32 %v1260_v56  ;;  %v1770_v62 = vpop.eup %1769  ;;  %vm1057_vm2 = vmor %vm1055_vm1, %vm1056_vm0  ;;  %vm1277_vm7 = vweird.f32 %v1260_v56 }
 0x234   :  { %v1051_v32 = vmul.f32 %v1768_v57, %v1050_v35  ;;  %v638_v0 = vsel %vm637_vm12, %v1764_v12, %v634_v61  ;;  %v1262_v9 = vmul.f32 %v1770_v62, %v1259_v30  ;;  %vm1268_vm3 = vweird.f32 %v1770_v62 }
 0x235   :  { %v1063_v55 = vsub.f32 1.5, %v1062_v7  ;;  %v643_v11 = vmul.f32 %v2291_v49, %v638_v0  ;;  %vm1269_vm5 = vmor %vm1267_vm4, %vm1268_vm3 }
 0x236   :  { %v1052_v14 = vmul.f32 0.5, %v1051_v32  ;;  %v1263_v36 = vmul.f32 %v1770_v62, %v1262_v9 }
 0x237   :  { %v1064_v40 = vmul.f32 %v1766_v42, %v1063_v55  ;;  %v647_v15 = vmul.f32 %v643_v11, %v2286_v4  ;;  %v645_v52 = vmul.f32 %v643_v11, %v2236_v21 }
 0x238   :  { %v1053_v34 = vsub.f32 1.5, %v1052_v14  ;;  %v1264_v13 = vmul.f32 0.5, %v1263_v36 }
 0x239   :  { %v1772_v10 = vpop.eup %1771  ;;  %v1068_v28 = vsel %vm1067_vm15, %v1766_v42, %v1064_v40  ;;  %v652_v6 = vsub.f32 %v2299_v53, %v647_v15 }
 0x23a   :  { %v1070_v58 = vmul.f32 %v2291_v49, %v1068_v28  ;;  %v1054_v16 = vmul.f32 %v1768_v57, %v1053_v34  ;;  %v1272_v17 = vmul.f32 %v1772_v10, %v1260_v56  ;;  %v1265_v20 = vsub.f32 1.5, %v1264_v13 }
 0x23b   :  { %v654_v59 = vadd.f32 %v652_v6, %v645_v52  ;;  %vm1278_vm6 = vweird.f32 %v1772_v10 }
 0x23c   :  { %v1074_v4 = vmul.f32 %v1070_v58, %v2308_v63  ;;  %v1058_v22 = vsel %vm1057_vm2, %v1768_v57, %v1054_v16  ;;  %v1266_v5 = vmul.f32 %v1770_v62, %v1265_v20  ;;  %v1273_v21 = vmul.f32 %v1772_v10, %v1272_v17  ;;  %vm1279_vm8 = vmor %vm1277_vm7, %vm1278_vm6 }
 0x23d   :  { %v1069_v24 = vmul.f32 %v2291_v49, %v1058_v22  ;;  %656 = vst [vmem:[#allocation12 + $0x20] sm:$0xff] %v654_v59  ;;  %v1072_v48 = vmul.f32 %v1070_v58, %v2251_v50 }
 0x23e   :  { %v1076_v26 = vsub.f32 %v2299_v53, %v1074_v4  ;;  %v1270_v2 = vsel %vm1269_vm5, %v1770_v62, %v1266_v5  ;;  %v1274_v23 = vmul.f32 0.5, %v1273_v21 }
 0x23f   :  { %v1073_v27 = vmul.f32 %v1069_v24, %v2304_v60  ;;  %v1281_v33 = vmul.f32 %v2291_v49, %v1270_v2  ;;  %v1071_v63 = vmul.f32 %v1069_v24, %v2244_v43 }
 0x240   :  { %v1078_v12 = vadd.f32 %v1076_v26, %v1072_v48  ;;  %v1275_v31 = vsub.f32 1.5, %v1274_v23 }
 0x241   :  { %v1075_v38 = vsub.f32 %v2299_v53, %v1073_v27  ;;  %v1285_v30 = vmul.f32 %v1281_v33, %v2311_v8  ;;  %v1283_v3 = vmul.f32 %v1281_v33, %v2242_v39 }
 0x242   :  { %1080 = vst [vmem:[#allocation12 + $0x30] sm:$0xff] %v1078_v12  ;;  %v1276_v25 = vmul.f32 %v1772_v10, %v1275_v31 }
 0x243   :  { %v1077_v50 = vadd.f32 %v1075_v38, %v1071_v63  ;;  %v1287_v60 = vsub.f32 %v2299_v53, %v1285_v30 }
 0x244   :  { %v1280_v18 = vsel %vm1279_vm8, %v1772_v10, %v1276_v25 }
 0x245   :  { %1079 = vst [vmem:[#allocation12 + $0x10] sm:$0xff] %v1077_v50  ;;  %v1289_v41 = vadd.f32 %v1287_v60, %v1283_v3  ;;  %v1282_v43 = vmul.f32 %v2291_v49, %v1280_v18 }
 0x247   :  { %1291 = vst [vmem:[#allocation12 + $0x18] sm:$0xff] %v1289_v41  ;;  %v1286_v42 = vmul.f32 %v1282_v43, %v2330_v29  ;;  %v1284_v8 = vmul.f32 %v1282_v43, %v2247_v46 }
 0x249   :  { %v1288_v39 = vsub.f32 %v2299_v53, %v1286_v42 }
 0x24b   :  { %v1290_v37 = vadd.f32 %v1288_v39, %v1284_v8 }
 0x24d   :  { %1292 = vst [vmem:[#allocation12 + $0x38] sm:$0xff] %v1290_v37 }
 0x24e   :  { %1305 = dma.vmem_to_hbm [thread:$0]  %s1298_s28, 1024, %s1300_s8, [#allocation5], %s1936_s9, %s1936_s9, %s1937_s10  }
 0x24f   :  { %1923 = dma.done.wait [#allocation5], 1024  }
 0x250   :  { %1924 = vsyncadd [#allocation5], 4294966272 }
 0x251   :  { %1310 = vsyncpa [#allocation4], 1 }
 0x252   :  { %1311 = vsyncpa [#allocation7], 1 }
 0x253   :  { %1312 = vsyncpa [#allocation10], 1 }
 0x254   :  { %1313 = vsyncpa [#allocation5], 1 }

</bundles_post_ra>
